<compile_context>
chip_gen: v7x
topology: tpu7x:2x2x1
jax: 0.10.0
libtpu: 0.0.40
codegen_flags: <defaults>
</compile_context>

<pallas_src>
import functools

import jax
import jax.numpy as jnp
import numpy as np
from jax.experimental import pallas as pl
from jax.experimental.pallas import tpu as pltpu

EPS_IN = 1e-5   # nn.InstanceNorm2d default
EPS_BN = 1e-5   # nn.BatchNorm2d default


# ----------------------------- fused Pallas kernel ----------------------------- #

def _snr2_kernel(x_ref, w1_ref, w11_ref, w2_ref, w21_ref, w3_ref,
                 s11_ref, b11_ref, s1_ref, b1_ref, s21_ref, b21_ref,
                 s2_ref, b2_ref, s3_ref, b3_ref, ml_ref, mr_ref,
                 o_ref, halo_ref, *, H, W, planes, pad):
    """One sample of SNR2_Bottleneck (stride=1, downsample=None), fully fused in VMEM.

    x_ref:    (HW, 4P) input sample (f32), also the residual
    w1_ref:   (4P, P)       conv1 1x1 weight (bf16)
    w11/2/21: (9, P, P)     3x3 conv weights, tap-major HWIO (bf16)
    w3_ref:   (P, 4P)       conv3 1x1 weight (bf16)
    s*/b*:    (1, C)        folded eval-BatchNorm scale / shift (f32)
    ml/mr:    (HW, 1)       column masks killing row-wrap taps of the flattened 3x3 conv
    halo_ref: (pad+HW+pad, P) zero-padded scratch for the shifted-matmul 3x3 convs
    """
    HW = H * W
    P = planes
    f32 = jnp.float32

    # Zero the halo scratch (only the halo rows logically need it; it is tiny).
    halo_ref[...] = jnp.zeros_like(halo_ref)

    x = x_ref[...].astype(f32)          # residual kept in f32
    ml = ml_ref[...]
    mr = mr_ref[...]

    def mm(a, w):                        # bf16 MXU matmul, f32 accumulation
        return jnp.dot(a.astype(jnp.bfloat16), w, preferred_element_type=f32)

    def inorm(y):                        # InstanceNorm: per-channel over spatial, one pass
        inv_n = 1.0 / HW
        mu = jnp.sum(y, axis=0, keepdims=True) * inv_n
        ex2 = jnp.sum(y * y, axis=0, keepdims=True) * inv_n
        var = jnp.maximum(ex2 - mu * mu, 0.0)
        return (y - mu) * jax.lax.rsqrt(var + EPS_IN)

    def conv3x3(a, w9_ref):              # 3x3 / pad=1 conv as 9 shifted in-VMEM matmuls
        halo_ref[pad:pad + HW, :] = a
        acc = jnp.zeros((HW, P), f32)
        for kh in range(3):
            for kw in range(3):
                ofs = (kh - 1) * W + (kw - 1)
                tap = halo_ref[pad + ofs:pad + ofs + HW, :]
                if kw == 0:
                    tap = tap * ml       # destination column 0 has no left neighbour
                elif kw == 2:
                    tap = tap * mr       # destination column W-1 has no right neighbour
                acc = acc + mm(tap, w9_ref[kh * 3 + kw])
        return acc

    # ---- stage 1: conv1(1x1) -> in1_0 -> (conv1_1 + bn1_1 + relu) -> bn1 -> relu ----
    x1 = mm(x, w1_ref[...])                                        # (HW, P)
    out1 = inorm(x1)
    r1 = conv3x3(x1 - out1, w11_ref)
    r1 = jnp.maximum(r1 * s11_ref[...] + b11_ref[...], 0.0)
    x1 = jnp.maximum((out1 + r1) * s1_ref[...] + b1_ref[...], 0.0)

    # ---- stage 2: conv2(3x3) -> in2_0 -> (conv2_1 + bn2_1 + relu) -> bn2 -> relu ----
    # TODO(synk): stride==2 path (maxpool on res1 + strided conv2) not implemented.
    x2 = conv3x3(x1, w2_ref)
    out2 = inorm(x2)
    r2 = conv3x3(x2 - out2 + r1, w21_ref)
    r2 = jnp.maximum(r2 * s21_ref[...] + b21_ref[...], 0.0)
    x2 = jnp.maximum((out2 + r2) * s2_ref[...] + b2_ref[...], 0.0)

    # ---- stage 3: conv3(1x1) -> bn3 -> + residual -> relu ----
    x3 = mm(x2, w3_ref[...]) * s3_ref[...] + b3_ref[...]           # (HW, 4P)
    o_ref[...] = jnp.maximum(x3 + x, 0.0).astype(o_ref.dtype)


# --------------------------------- wrapper --------------------------------- #

def snr2_bottleneck_forward(x_nchw, params, stride=1):
    """SNR2_Bottleneck forward (eval-mode BN), stride=1, downsample=None."""
    if stride != 1:
        # TODO(synk): stride==2 (maxpool of res1, strided conv2) not implemented.
        raise NotImplementedError("only stride=1 / downsample=None is supported")
    N, Cin, H, W = x_nchw.shape
    P = params["w1"].shape[1]
    assert Cin == 4 * P, "identity residual requires inplanes == 4 * planes"
    HW = H * W

    x = jnp.transpose(x_nchw, (0, 2, 3, 1)).reshape(N, HW, Cin).astype(jnp.float32)

    # Fold eval-mode BatchNorm into per-channel scale/shift (f32).
    def fold_bn(tag):
        g, b = params[f"g{tag}"], params[f"b{tag}"]
        rm, rv = params[f"rm{tag}"], params[f"rv{tag}"]
        s = (g * jax.lax.rsqrt(rv + EPS_BN)).astype(jnp.float32)
        return s.reshape(1, -1), (b - rm * s).astype(jnp.float32).reshape(1, -1)

    s11, b11 = fold_bn("1_1")
    s1, b1 = fold_bn("1")
    s21, b21 = fold_bn("2_1")
    s2, b2 = fold_bn("2")
    s3, b3 = fold_bn("3")

    # Weights in matmul layout, bf16 (halves weight HBM traffic; MXU-native).
    w1m = params["w1"].astype(jnp.bfloat16)                               # (Cin, P)
    w11m = params["w1_1_hwio"].reshape(9, P, P).astype(jnp.bfloat16)
    w2m = params["w2_hwio"].reshape(9, P, P).astype(jnp.bfloat16)
    w21m = params["w2_1_hwio"].reshape(9, P, P).astype(jnp.bfloat16)
    w3m = params["w3"].astype(jnp.bfloat16)                               # (P, 4P)

    # Column masks: zero the 3x3 taps that would wrap across image rows once flattened.
    col = jnp.arange(HW, dtype=jnp.int32) % W
    mask_l = (col != 0).astype(jnp.float32).reshape(HW, 1)
    mask_r = (col != W - 1).astype(jnp.float32).reshape(HW, 1)

    # Halo padding (>= W + 1, kept 8-aligned so the interior store stays sublane-aligned).
    pad = max(8, ((W + 1 + 7) // 8) * 8)

    rep = lambda n: (0, 0)             # grid-invariant 2-D operands
    rep3 = lambda n: (0, 0, 0)
    per_sample = lambda n: (n, 0, 0)

    kernel = functools.partial(_snr2_kernel, H=H, W=W, planes=P, pad=pad)

    flops = 2 * N * HW * (Cin * P + 27 * P * P + 4 * P * P)
    bytes_accessed = int(
        2 * N * HW * Cin * 4                                    # x in + out, f32
        + (w1m.size + w11m.size + w2m.size + w21m.size + w3m.size) * 2
        + (8 * P + 2 * Cin + 2 * HW) * 4)

    out = pl.pallas_call(
        kernel,
        out_shape=jax.ShapeDtypeStruct((N, HW, Cin), jnp.float32),
        grid=(N,),
        in_specs=[
            pl.BlockSpec((None, HW, Cin), per_sample),                    # x / residual
            pl.BlockSpec((Cin, P), rep),                                  # conv1
            pl.BlockSpec((9, P, P), rep3),                                # conv1_1
            pl.BlockSpec((9, P, P), rep3),                                # conv2
            pl.BlockSpec((9, P, P), rep3),                                # conv2_1
            pl.BlockSpec((P, Cin), rep),                                  # conv3
            pl.BlockSpec((1, P), rep), pl.BlockSpec((1, P), rep),         # bn1_1
            pl.BlockSpec((1, P), rep), pl.BlockSpec((1, P), rep),         # bn1
            pl.BlockSpec((1, P), rep), pl.BlockSpec((1, P), rep),         # bn2_1
            pl.BlockSpec((1, P), rep), pl.BlockSpec((1, P), rep),         # bn2
            pl.BlockSpec((1, Cin), rep), pl.BlockSpec((1, Cin), rep),     # bn3
            pl.BlockSpec((HW, 1), rep), pl.BlockSpec((HW, 1), rep),       # column masks
        ],
        out_specs=pl.BlockSpec((None, HW, Cin), per_sample),
        scratch_shapes=[pltpu.VMEM((2 * pad + HW, P), jnp.float32)],
        compiler_params=pltpu.CompilerParams(
            dimension_semantics=("parallel",),
            # Tiny for this demo config; re-derive for real ResNet shapes (v7x: 64 MiB VMEM).
            vmem_limit_bytes=32 * 1024 * 1024,
        ),
        cost_estimate=pl.CostEstimate(
            flops=flops, transcendentals=2 * N * P, bytes_accessed=bytes_accessed),
    )(x, w1m, w11m, w2m, w21m, w3m,
      s11, b11, s1, b1, s21, b21, s2, b2, s3, b3, mask_l, mask_r)

    return jnp.transpose(out.reshape(N, H, W, Cin), (0, 3, 1, 2))


# ----------------------------- pure-JAX reference ----------------------------- #

def _ref_forward(x_nchw, p, stride=1):
    """Faithful SNR2_Bottleneck.forward (eval BN), mirroring the kernel's precision policy:
    conv inputs/weights in bf16 with f32 accumulation, norms/epilogues in f32."""
    assert stride == 1
    P = p["w1"].shape[1]
    x = jnp.transpose(x_nchw, (0, 2, 3, 1)).astype(jnp.float32)   # NHWC

    def conv(a, w_hwio, s=1, pad=0):
        return jax.lax.conv_general_dilated(
            a.astype(jnp.bfloat16), w_hwio.astype(jnp.bfloat16), (s, s),
            [(pad, pad), (pad, pad)],
            dimension_numbers=("NHWC", "HWIO", "NHWC"),
            preferred_element_type=jnp.float32)

    def inorm(a):
        mu = a.mean(axis=(1, 2), keepdims=True)
        var = ((a - mu) ** 2).mean(axis=(1, 2), keepdims=True)
        return (a - mu) * jax.lax.rsqrt(var + EPS_IN)

    def bn(a, tag):
        g, b, rm, rv = p[f"g{tag}"], p[f"b{tag}"], p[f"rm{tag}"], p[f"rv{tag}"]
        return (a - rm) * jax.lax.rsqrt(rv + EPS_BN) * g + b

    w1 = p["w1"].reshape(1, 1, 4 * P, P)
    w3 = p["w3"].reshape(1, 1, P, 4 * P)

    x1 = conv(x, w1)
    out1 = inorm(x1)
    res1 = jnp.maximum(bn(conv(x1 - out1, p["w1_1_hwio"], 1, 1), "1_1"), 0.0)
    x1 = jnp.maximum(bn(out1 + res1, "1"), 0.0)

    x2 = conv(x1, p["w2_hwio"], stride, 1)
    out2 = inorm(x2)
    res2 = jnp.maximum(bn(conv(x2 - out2 + res1, p["w2_1_hwio"], 1, 1), "2_1"), 0.0)
    x2 = jnp.maximum(bn(out2 + res2, "2"), 0.0)

    x3 = bn(conv(x2, w3), "3")
    return jnp.transpose(jnp.maximum(x3 + x, 0.0), (0, 3, 1, 2))


# ---------------------------------- main ---------------------------------- #

if __name__ == "__main__":
    # Config keeps the identity residual valid (downsample=None => inplanes == 4 * planes)
    # and makes the HBM-visible channel dim lane-dense (4 * planes = 128).
    batch, planes, H, W = 2, 32, 8, 8
    inplanes = planes * 4
    stride = 1

    key = jax.random.PRNGKey(0)
    ks = jax.random.split(key, 12)

    def bn_params(k, c):
        k0, k1, k2, k3 = jax.random.split(k, 4)
        return (jax.random.uniform(k0, (c,), jnp.float32, 0.5, 1.5),    # gamma
                0.1 * jax.random.normal(k1, (c,), jnp.float32),          # beta
                0.1 * jax.random.normal(k2, (c,), jnp.float32),          # running_mean
                jax.random.uniform(k3, (c,), jnp.float32, 0.5, 1.5))     # running_var

    params = {
        "w1": 0.1 * jax.random.normal(ks[0], (inplanes, planes), jnp.float32),
        "w1_1_hwio": 0.1 * jax.random.normal(ks[1], (3, 3, planes, planes), jnp.float32),
        "w2_hwio": 0.1 * jax.random.normal(ks[2], (3, 3, planes, planes), jnp.float32),
        "w2_1_hwio": 0.1 * jax.random.normal(ks[3], (3, 3, planes, planes), jnp.float32),
        "w3": 0.1 * jax.random.normal(ks[4], (planes, planes * 4), jnp.float32),
    }
    for tag, k, c in (("1_1", ks[5], planes), ("1", ks[6], planes),
                      ("2_1", ks[7], planes), ("2", ks[8], planes),
                      ("3", ks[9], planes * 4)):
        g, b, rm, rv = bn_params(k, c)
        params[f"g{tag}"] = g
        params[f"b{tag}"] = b
        params[f"rm{tag}"] = rm
        params[f"rv{tag}"] = rv

    x = jax.random.normal(ks[10], (batch, inplanes, H, W), jnp.float32)

    fwd = jax.jit(functools.partial(snr2_bottleneck_forward, stride=stride))
    out = jax.block_until_ready(fwd(x, params))

    ref = _ref_forward(x, params, stride=stride)
    np.testing.assert_allclose(np.asarray(out), np.asarray(ref), rtol=1e-2, atol=1e-2)

    print("KERNEL_OK")
</pallas_src>

<mosaic_0001>
module attributes {stable_mosaic.version = 11 : i64} {
  func.func @_snr2_kernel(%arg0: i32, %arg1: memref<1x64x128xf32, #tpu.memory_space<vmem>>, %arg2: memref<128x32xbf16, #tpu.memory_space<vmem>>, %arg3: memref<9x32x32xbf16, #tpu.memory_space<vmem>>, %arg4: memref<9x32x32xbf16, #tpu.memory_space<vmem>>, %arg5: memref<9x32x32xbf16, #tpu.memory_space<vmem>>, %arg6: memref<32x128xbf16, #tpu.memory_space<vmem>>, %arg7: memref<1x32xf32, #tpu.memory_space<vmem>>, %arg8: memref<1x32xf32, #tpu.memory_space<vmem>>, %arg9: memref<1x32xf32, #tpu.memory_space<vmem>>, %arg10: memref<1x32xf32, #tpu.memory_space<vmem>>, %arg11: memref<1x32xf32, #tpu.memory_space<vmem>>, %arg12: memref<1x32xf32, #tpu.memory_space<vmem>>, %arg13: memref<1x32xf32, #tpu.memory_space<vmem>>, %arg14: memref<1x32xf32, #tpu.memory_space<vmem>>, %arg15: memref<1x128xf32, #tpu.memory_space<vmem>>, %arg16: memref<1x128xf32, #tpu.memory_space<vmem>>, %arg17: memref<64x1xf32, #tpu.memory_space<vmem>>, %arg18: memref<64x1xf32, #tpu.memory_space<vmem>>, %arg19: memref<1x64x128xf32, #tpu.memory_space<vmem>>, %arg20: memref<96x32xf32, #tpu.memory_space<vmem>>) attributes {dimension_semantics = [#tpu.dimension_semantics<parallel>], iteration_bounds = array<i64: 2>, scalar_prefetch = 0 : i64, scratch_operands = 1 : i64, tpu.core_type = #tpu.core_type<tc>, window_params = [{transform_indices = @transform_0, window_bounds = array<i64: 1, 64, 128>}, {pipeline_mode = #tpu.pipeline_mode<synchronous>, transform_indices = @transform_1, window_bounds = array<i64: 128, 32>}, {pipeline_mode = #tpu.pipeline_mode<synchronous>, transform_indices = @transform_2, window_bounds = array<i64: 9, 32, 32>}, {pipeline_mode = #tpu.pipeline_mode<synchronous>, transform_indices = @transform_3, window_bounds = array<i64: 9, 32, 32>}, {pipeline_mode = #tpu.pipeline_mode<synchronous>, transform_indices = @transform_4, window_bounds = array<i64: 9, 32, 32>}, {pipeline_mode = #tpu.pipeline_mode<synchronous>, transform_indices = @transform_5, window_bounds = array<i64: 32, 128>}, {pipeline_mode = #tpu.pipeline_mode<synchronous>, transform_indices = @transform_6, window_bounds = array<i64: 1, 32>}, {pipeline_mode = #tpu.pipeline_mode<synchronous>, transform_indices = @transform_7, window_bounds = array<i64: 1, 32>}, {pipeline_mode = #tpu.pipeline_mode<synchronous>, transform_indices = @transform_8, window_bounds = array<i64: 1, 32>}, {pipeline_mode = #tpu.pipeline_mode<synchronous>, transform_indices = @transform_9, window_bounds = array<i64: 1, 32>}, {pipeline_mode = #tpu.pipeline_mode<synchronous>, transform_indices = @transform_10, window_bounds = array<i64: 1, 32>}, {pipeline_mode = #tpu.pipeline_mode<synchronous>, transform_indices = @transform_11, window_bounds = array<i64: 1, 32>}, {pipeline_mode = #tpu.pipeline_mode<synchronous>, transform_indices = @transform_12, window_bounds = array<i64: 1, 32>}, {pipeline_mode = #tpu.pipeline_mode<synchronous>, transform_indices = @transform_13, window_bounds = array<i64: 1, 32>}, {pipeline_mode = #tpu.pipeline_mode<synchronous>, transform_indices = @transform_14, window_bounds = array<i64: 1, 128>}, {pipeline_mode = #tpu.pipeline_mode<synchronous>, transform_indices = @transform_15, window_bounds = array<i64: 1, 128>}, {pipeline_mode = #tpu.pipeline_mode<synchronous>, transform_indices = @transform_16, window_bounds = array<i64: 64, 1>}, {pipeline_mode = #tpu.pipeline_mode<synchronous>, transform_indices = @transform_17, window_bounds = array<i64: 64, 1>}, {transform_indices = @transform_18, window_bounds = array<i64: 1, 64, 128>}]} {
    %cst = arith.constant 0.000000e+00 : f32
    %0 = vector.broadcast %cst : f32 to vector<96x32xf32>
    %c0 = arith.constant 0 : index
    %c0_0 = arith.constant 0 : index
    %1 = vector.load %arg20[%c0, %c0_0] : memref<96x32xf32, #tpu.memory_space<vmem>>, vector<96x32xf32>
    tpu.vector_store %arg20[%c0, %c0_0], %0 {strides = array<i32>} : memref<96x32xf32, #tpu.memory_space<vmem>>, vector<96x32xf32>,
    %c0_1 = arith.constant 0 : index
    %c0_2 = arith.constant 0 : index
    %c0_3 = arith.constant 0 : index
    %2 = vector.load %arg1[%c0_1, %c0_2, %c0_3] : memref<1x64x128xf32, #tpu.memory_space<vmem>>, vector<1x64x128xf32>
    %3 = vector.shape_cast %2 : vector<1x64x128xf32> to vector<64x128xf32>
    %c0_4 = arith.constant 0 : index
    %c0_5 = arith.constant 0 : index
    %4 = vector.load %arg17[%c0_4, %c0_5] : memref<64x1xf32, #tpu.memory_space<vmem>>, vector<64x1xf32>
    %c0_6 = arith.constant 0 : index
    %c0_7 = arith.constant 0 : index
    %5 = vector.load %arg18[%c0_6, %c0_7] : memref<64x1xf32, #tpu.memory_space<vmem>>, vector<64x1xf32>
    %c0_8 = arith.constant 0 : index
    %c0_9 = arith.constant 0 : index
    %6 = vector.load %arg2[%c0_8, %c0_9] : memref<128x32xbf16, #tpu.memory_space<vmem>>, vector<128x32xbf16>
    %7 = arith.truncf %3 : vector<64x128xf32> to vector<64x128xbf16>
    %cst_10 = arith.constant dense<0.000000e+00> : vector<64x32xf32>
    %8 = tpu.matmul %7, %6, %cst_10 {dimension_numbers = #tpu.dot_dimension_numbers<[1], [0], [0], [1], [0, 0, 1, 1], [], []>} : vector<64x128xbf16>, vector<128x32xbf16>, vector<64x32xf32> -> vector<64x32xf32>
    %cst_11 = arith.constant dense<0.000000e+00> : vector<32xf32>
    %9 = vector.multi_reduction <add>, %8, %cst_11 [0] : vector<64x32xf32> to vector<32xf32>
    %10 = vector.shape_cast %9 : vector<32xf32> to vector<1x32xf32>
    %cst_12 = arith.constant 1.562500e-02 : f32
    %11 = vector.broadcast %cst_12 : f32 to vector<1x32xf32>
    %12 = arith.mulf %10, %11 : vector<1x32xf32>
    %13 = arith.mulf %8, %8 : vector<64x32xf32>
    %cst_13 = arith.constant dense<0.000000e+00> : vector<32xf32>
    %14 = vector.multi_reduction <add>, %13, %cst_13 [0] : vector<64x32xf32> to vector<32xf32>
    %15 = vector.shape_cast %14 : vector<32xf32> to vector<1x32xf32>
    %cst_14 = arith.constant 1.562500e-02 : f32
    %16 = vector.broadcast %cst_14 : f32 to vector<1x32xf32>
    %17 = arith.mulf %15, %16 : vector<1x32xf32>
    %18 = arith.mulf %12, %12 : vector<1x32xf32>
    %19 = arith.subf %17, %18 : vector<1x32xf32>
    %cst_15 = arith.constant 0.000000e+00 : f32
    %20 = vector.broadcast %cst_15 : f32 to vector<1x32xf32>
    %21 = arith.maximumf %19, %20 : vector<1x32xf32>
    %22 = vector.broadcast %12 : vector<1x32xf32> to vector<64x32xf32>
    %23 = arith.subf %8, %22 : vector<64x32xf32>
    %cst_16 = arith.constant 9.99999974E-6 : f32
    %24 = vector.broadcast %cst_16 : f32 to vector<1x32xf32>
    %25 = arith.addf %21, %24 : vector<1x32xf32>
    %26 = math.rsqrt %25 : vector<1x32xf32>
    %27 = vector.broadcast %26 : vector<1x32xf32> to vector<64x32xf32>
    %28 = arith.mulf %23, %27 : vector<64x32xf32>
    %29 = arith.subf %8, %28 : vector<64x32xf32>
    %c16 = arith.constant 16 : index
    %c0_17 = arith.constant 0 : index
    %30 = vector.load %arg20[%c16, %c0_17] : memref<96x32xf32, #tpu.memory_space<vmem>>, vector<64x32xf32>
    tpu.vector_store %arg20[%c16, %c0_17], %29 {strides = array<i32>} : memref<96x32xf32, #tpu.memory_space<vmem>>, vector<64x32xf32>,
    %cst_18 = arith.constant 0.000000e+00 : f32
    %31 = vector.broadcast %cst_18 : f32 to vector<64x32xf32>
    %c7 = arith.constant 7 : index
    %c0_19 = arith.constant 0 : index
    %32 = vector.load %arg20[%c7, %c0_19] : memref<96x32xf32, #tpu.memory_space<vmem>>, vector<64x32xf32>
    %33 = vector.broadcast %4 : vector<64x1xf32> to vector<64x32xf32>
    %34 = arith.mulf %32, %33 : vector<64x32xf32>
    %c0_20 = arith.constant 0 : index
    %c0_21 = arith.constant 0 : index
    %c0_22 = arith.constant 0 : index
    %35 = vector.load %arg3[%c0_20, %c0_21, %c0_22] : memref<9x32x32xbf16, #tpu.memory_space<vmem>>, vector<1x32x32xbf16>
    %36 = vector.shape_cast %35 : vector<1x32x32xbf16> to vector<32x32xbf16>
    %37 = arith.truncf %34 : vector<64x32xf32> to vector<64x32xbf16>
    %cst_23 = arith.constant dense<0.000000e+00> : vector<64x32xf32>
    %38 = tpu.matmul %37, %36, %cst_23 {dimension_numbers = #tpu.dot_dimension_numbers<[1], [0], [0], [1], [0, 0, 1, 1], [], []>} : vector<64x32xbf16>, vector<32x32xbf16>, vector<64x32xf32> -> vector<64x32xf32>
    %39 = arith.addf %31, %38 : vector<64x32xf32>
    %c8 = arith.constant 8 : index
    %c0_24 = arith.constant 0 : index
    %40 = vector.load %arg20[%c8, %c0_24] : memref<96x32xf32, #tpu.memory_space<vmem>>, vector<64x32xf32>
    %c1 = arith.constant 1 : index
    %c0_25 = arith.constant 0 : index
    %c0_26 = arith.constant 0 : index
    %41 = vector.load %arg3[%c1, %c0_25, %c0_26] : memref<9x32x32xbf16, #tpu.memory_space<vmem>>, vector<1x32x32xbf16>
    %42 = vector.shape_cast %41 : vector<1x32x32xbf16> to vector<32x32xbf16>
    %43 = arith.truncf %40 : vector<64x32xf32> to vector<64x32xbf16>
    %cst_27 = arith.constant dense<0.000000e+00> : vector<64x32xf32>
    %44 = tpu.matmul %43, %42, %cst_27 {dimension_numbers = #tpu.dot_dimension_numbers<[1], [0], [0], [1], [0, 0, 1, 1], [], []>} : vector<64x32xbf16>, vector<32x32xbf16>, vector<64x32xf32> -> vector<64x32xf32>
    %45 = arith.addf %39, %44 : vector<64x32xf32>
    %c9 = arith.constant 9 : index
    %c0_28 = arith.constant 0 : index
    %46 = vector.load %arg20[%c9, %c0_28] : memref<96x32xf32, #tpu.memory_space<vmem>>, vector<64x32xf32>
    %47 = vector.broadcast %5 : vector<64x1xf32> to vector<64x32xf32>
    %48 = arith.mulf %46, %47 : vector<64x32xf32>
    %c2 = arith.constant 2 : index
    %c0_29 = arith.constant 0 : index
    %c0_30 = arith.constant 0 : index
    %49 = vector.load %arg3[%c2, %c0_29, %c0_30] : memref<9x32x32xbf16, #tpu.memory_space<vmem>>, vector<1x32x32xbf16>
    %50 = vector.shape_cast %49 : vector<1x32x32xbf16> to vector<32x32xbf16>
    %51 = arith.truncf %48 : vector<64x32xf32> to vector<64x32xbf16>
    %cst_31 = arith.constant dense<0.000000e+00> : vector<64x32xf32>
    %52 = tpu.matmul %51, %50, %cst_31 {dimension_numbers = #tpu.dot_dimension_numbers<[1], [0], [0], [1], [0, 0, 1, 1], [], []>} : vector<64x32xbf16>, vector<32x32xbf16>, vector<64x32xf32> -> vector<64x32xf32>
    %53 = arith.addf %45, %52 : vector<64x32xf32>
    %c15 = arith.constant 15 : index
    %c0_32 = arith.constant 0 : index
    %54 = vector.load %arg20[%c15, %c0_32] : memref<96x32xf32, #tpu.memory_space<vmem>>, vector<64x32xf32>
    %55 = vector.broadcast %4 : vector<64x1xf32> to vector<64x32xf32>
    %56 = arith.mulf %54, %55 : vector<64x32xf32>
    %c3 = arith.constant 3 : index
    %c0_33 = arith.constant 0 : index
    %c0_34 = arith.constant 0 : index
    %57 = vector.load %arg3[%c3, %c0_33, %c0_34] : memref<9x32x32xbf16, #tpu.memory_space<vmem>>, vector<1x32x32xbf16>
    %58 = vector.shape_cast %57 : vector<1x32x32xbf16> to vector<32x32xbf16>
    %59 = arith.truncf %56 : vector<64x32xf32> to vector<64x32xbf16>
    %cst_35 = arith.constant dense<0.000000e+00> : vector<64x32xf32>
    %60 = tpu.matmul %59, %58, %cst_35 {dimension_numbers = #tpu.dot_dimension_numbers<[1], [0], [0], [1], [0, 0, 1, 1], [], []>} : vector<64x32xbf16>, vector<32x32xbf16>, vector<64x32xf32> -> vector<64x32xf32>
    %61 = arith.addf %53, %60 : vector<64x32xf32>
    %c16_36 = arith.constant 16 : index
    %c0_37 = arith.constant 0 : index
    %62 = vector.load %arg20[%c16_36, %c0_37] : memref<96x32xf32, #tpu.memory_space<vmem>>, vector<64x32xf32>
    %c4 = arith.constant 4 : index
    %c0_38 = arith.constant 0 : index
    %c0_39 = arith.constant 0 : index
    %63 = vector.load %arg3[%c4, %c0_38, %c0_39] : memref<9x32x32xbf16, #tpu.memory_space<vmem>>, vector<1x32x32xbf16>
    %64 = vector.shape_cast %63 : vector<1x32x32xbf16> to vector<32x32xbf16>
    %65 = arith.truncf %62 : vector<64x32xf32> to vector<64x32xbf16>
    %cst_40 = arith.constant dense<0.000000e+00> : vector<64x32xf32>
    %66 = tpu.matmul %65, %64, %cst_40 {dimension_numbers = #tpu.dot_dimension_numbers<[1], [0], [0], [1], [0, 0, 1, 1], [], []>} : vector<64x32xbf16>, vector<32x32xbf16>, vector<64x32xf32> -> vector<64x32xf32>
    %67 = arith.addf %61, %66 : vector<64x32xf32>
    %c17 = arith.constant 17 : index
    %c0_41 = arith.constant 0 : index
    %68 = vector.load %arg20[%c17, %c0_41] : memref<96x32xf32, #tpu.memory_space<vmem>>, vector<64x32xf32>
    %69 = vector.broadcast %5 : vector<64x1xf32> to vector<64x32xf32>
    %70 = arith.mulf %68, %69 : vector<64x32xf32>
    %c5 = arith.constant 5 : index
    %c0_42 = arith.constant 0 : index
    %c0_43 = arith.constant 0 : index
    %71 = vector.load %arg3[%c5, %c0_42, %c0_43] : memref<9x32x32xbf16, #tpu.memory_space<vmem>>, vector<1x32x32xbf16>
    %72 = vector.shape_cast %71 : vector<1x32x32xbf16> to vector<32x32xbf16>
    %73 = arith.truncf %70 : vector<64x32xf32> to vector<64x32xbf16>
    %cst_44 = arith.constant dense<0.000000e+00> : vector<64x32xf32>
    %74 = tpu.matmul %73, %72, %cst_44 {dimension_numbers = #tpu.dot_dimension_numbers<[1], [0], [0], [1], [0, 0, 1, 1], [], []>} : vector<64x32xbf16>, vector<32x32xbf16>, vector<64x32xf32> -> vector<64x32xf32>
    %75 = arith.addf %67, %74 : vector<64x32xf32>
    %c23 = arith.constant 23 : index
    %c0_45 = arith.constant 0 : index
    %76 = vector.load %arg20[%c23, %c0_45] : memref<96x32xf32, #tpu.memory_space<vmem>>, vector<64x32xf32>
    %77 = vector.broadcast %4 : vector<64x1xf32> to vector<64x32xf32>
    %78 = arith.mulf %76, %77 : vector<64x32xf32>
    %c6 = arith.constant 6 : index
    %c0_46 = arith.constant 0 : index
    %c0_47 = arith.constant 0 : index
    %79 = vector.load %arg3[%c6, %c0_46, %c0_47] : memref<9x32x32xbf16, #tpu.memory_space<vmem>>, vector<1x32x32xbf16>
    %80 = vector.shape_cast %79 : vector<1x32x32xbf16> to vector<32x32xbf16>
    %81 = arith.truncf %78 : vector<64x32xf32> to vector<64x32xbf16>
    %cst_48 = arith.constant dense<0.000000e+00> : vector<64x32xf32>
    %82 = tpu.matmul %81, %80, %cst_48 {dimension_numbers = #tpu.dot_dimension_numbers<[1], [0], [0], [1], [0, 0, 1, 1], [], []>} : vector<64x32xbf16>, vector<32x32xbf16>, vector<64x32xf32> -> vector<64x32xf32>
    %83 = arith.addf %75, %82 : vector<64x32xf32>
    %c24 = arith.constant 24 : index
    %c0_49 = arith.constant 0 : index
    %84 = vector.load %arg20[%c24, %c0_49] : memref<96x32xf32, #tpu.memory_space<vmem>>, vector<64x32xf32>
    %c7_50 = arith.constant 7 : index
    %c0_51 = arith.constant 0 : index
    %c0_52 = arith.constant 0 : index
    %85 = vector.load %arg3[%c7_50, %c0_51, %c0_52] : memref<9x32x32xbf16, #tpu.memory_space<vmem>>, vector<1x32x32xbf16>
    %86 = vector.shape_cast %85 : vector<1x32x32xbf16> to vector<32x32xbf16>
    %87 = arith.truncf %84 : vector<64x32xf32> to vector<64x32xbf16>
    %cst_53 = arith.constant dense<0.000000e+00> : vector<64x32xf32>
    %88 = tpu.matmul %87, %86, %cst_53 {dimension_numbers = #tpu.dot_dimension_numbers<[1], [0], [0], [1], [0, 0, 1, 1], [], []>} : vector<64x32xbf16>, vector<32x32xbf16>, vector<64x32xf32> -> vector<64x32xf32>
    %89 = arith.addf %83, %88 : vector<64x32xf32>
    %c25 = arith.constant 25 : index
    %c0_54 = arith.constant 0 : index
    %90 = vector.load %arg20[%c25, %c0_54] : memref<96x32xf32, #tpu.memory_space<vmem>>, vector<64x32xf32>
    %91 = vector.broadcast %5 : vector<64x1xf32> to vector<64x32xf32>
    %92 = arith.mulf %90, %91 : vector<64x32xf32>
    %c8_55 = arith.constant 8 : index
    %c0_56 = arith.constant 0 : index
    %c0_57 = arith.constant 0 : index
    %93 = vector.load %arg3[%c8_55, %c0_56, %c0_57] : memref<9x32x32xbf16, #tpu.memory_space<vmem>>, vector<1x32x32xbf16>
    %94 = vector.shape_cast %93 : vector<1x32x32xbf16> to vector<32x32xbf16>
    %95 = arith.truncf %92 : vector<64x32xf32> to vector<64x32xbf16>
    %cst_58 = arith.constant dense<0.000000e+00> : vector<64x32xf32>
    %96 = tpu.matmul %95, %94, %cst_58 {dimension_numbers = #tpu.dot_dimension_numbers<[1], [0], [0], [1], [0, 0, 1, 1], [], []>} : vector<64x32xbf16>, vector<32x32xbf16>, vector<64x32xf32> -> vector<64x32xf32>
    %97 = arith.addf %89, %96 : vector<64x32xf32>
    %c0_59 = arith.constant 0 : index
    %c0_60 = arith.constant 0 : index
    %98 = vector.load %arg7[%c0_59, %c0_60] : memref<1x32xf32, #tpu.memory_space<vmem>>, vector<1x32xf32>
    %99 = vector.broadcast %98 : vector<1x32xf32> to vector<64x32xf32>
    %100 = arith.mulf %97, %99 : vector<64x32xf32>
    %c0_61 = arith.constant 0 : index
    %c0_62 = arith.constant 0 : index
    %101 = vector.load %arg8[%c0_61, %c0_62] : memref<1x32xf32, #tpu.memory_space<vmem>>, vector<1x32xf32>
    %102 = vector.broadcast %101 : vector<1x32xf32> to vector<64x32xf32>
    %103 = arith.addf %100, %102 : vector<64x32xf32>
    %cst_63 = arith.constant 0.000000e+00 : f32
    %104 = vector.broadcast %cst_63 : f32 to vector<64x32xf32>
    %105 = arith.maximumf %103, %104 : vector<64x32xf32>
    %106 = arith.addf %28, %105 : vector<64x32xf32>
    %c0_64 = arith.constant 0 : index
    %c0_65 = arith.constant 0 : index
    %107 = vector.load %arg9[%c0_64, %c0_65] : memref<1x32xf32, #tpu.memory_space<vmem>>, vector<1x32xf32>
    %108 = vector.broadcast %107 : vector<1x32xf32> to vector<64x32xf32>
    %109 = arith.mulf %106, %108 : vector<64x32xf32>
    %c0_66 = arith.constant 0 : index
    %c0_67 = arith.constant 0 : index
    %110 = vector.load %arg10[%c0_66, %c0_67] : memref<1x32xf32, #tpu.memory_space<vmem>>, vector<1x32xf32>
    %111 = vector.broadcast %110 : vector<1x32xf32> to vector<64x32xf32>
    %112 = arith.addf %109, %111 : vector<64x32xf32>
    %cst_68 = arith.constant 0.000000e+00 : f32
    %113 = vector.broadcast %cst_68 : f32 to vector<64x32xf32>
    %114 = arith.maximumf %112, %113 : vector<64x32xf32>
    %c16_69 = arith.constant 16 : index
    %c0_70 = arith.constant 0 : index
    %115 = vector.load %arg20[%c16_69, %c0_70] : memref<96x32xf32, #tpu.memory_space<vmem>>, vector<64x32xf32>
    tpu.vector_store %arg20[%c16_69, %c0_70], %114 {strides = array<i32>} : memref<96x32xf32, #tpu.memory_space<vmem>>, vector<64x32xf32>,
    %cst_71 = arith.constant 0.000000e+00 : f32
    %116 = vector.broadcast %cst_71 : f32 to vector<64x32xf32>
    %c7_72 = arith.constant 7 : index
    %c0_73 = arith.constant 0 : index
    %117 = vector.load %arg20[%c7_72, %c0_73] : memref<96x32xf32, #tpu.memory_space<vmem>>, vector<64x32xf32>
    %118 = vector.broadcast %4 : vector<64x1xf32> to vector<64x32xf32>
    %119 = arith.mulf %117, %118 : vector<64x32xf32>
    %c0_74 = arith.constant 0 : index
    %c0_75 = arith.constant 0 : index
    %c0_76 = arith.constant 0 : index
    %120 = vector.load %arg4[%c0_74, %c0_75, %c0_76] : memref<9x32x32xbf16, #tpu.memory_space<vmem>>, vector<1x32x32xbf16>
    %121 = vector.shape_cast %120 : vector<1x32x32xbf16> to vector<32x32xbf16>
    %122 = arith.truncf %119 : vector<64x32xf32> to vector<64x32xbf16>
    %cst_77 = arith.constant dense<0.000000e+00> : vector<64x32xf32>
    %123 = tpu.matmul %122, %121, %cst_77 {dimension_numbers = #tpu.dot_dimension_numbers<[1], [0], [0], [1], [0, 0, 1, 1], [], []>} : vector<64x32xbf16>, vector<32x32xbf16>, vector<64x32xf32> -> vector<64x32xf32>
    %124 = arith.addf %116, %123 : vector<64x32xf32>
    %c8_78 = arith.constant 8 : index
    %c0_79 = arith.constant 0 : index
    %125 = vector.load %arg20[%c8_78, %c0_79] : memref<96x32xf32, #tpu.memory_space<vmem>>, vector<64x32xf32>
    %c1_80 = arith.constant 1 : index
    %c0_81 = arith.constant 0 : index
    %c0_82 = arith.constant 0 : index
    %126 = vector.load %arg4[%c1_80, %c0_81, %c0_82] : memref<9x32x32xbf16, #tpu.memory_space<vmem>>, vector<1x32x32xbf16>
    %127 = vector.shape_cast %126 : vector<1x32x32xbf16> to vector<32x32xbf16>
    %128 = arith.truncf %125 : vector<64x32xf32> to vector<64x32xbf16>
    %cst_83 = arith.constant dense<0.000000e+00> : vector<64x32xf32>
    %129 = tpu.matmul %128, %127, %cst_83 {dimension_numbers = #tpu.dot_dimension_numbers<[1], [0], [0], [1], [0, 0, 1, 1], [], []>} : vector<64x32xbf16>, vector<32x32xbf16>, vector<64x32xf32> -> vector<64x32xf32>
    %130 = arith.addf %124, %129 : vector<64x32xf32>
    %c9_84 = arith.constant 9 : index
    %c0_85 = arith.constant 0 : index
    %131 = vector.load %arg20[%c9_84, %c0_85] : memref<96x32xf32, #tpu.memory_space<vmem>>, vector<64x32xf32>
    %132 = vector.broadcast %5 : vector<64x1xf32> to vector<64x32xf32>
    %133 = arith.mulf %131, %132 : vector<64x32xf32>
    %c2_86 = arith.constant 2 : index
    %c0_87 = arith.constant 0 : index
    %c0_88 = arith.constant 0 : index
    %134 = vector.load %arg4[%c2_86, %c0_87, %c0_88] : memref<9x32x32xbf16, #tpu.memory_space<vmem>>, vector<1x32x32xbf16>
    %135 = vector.shape_cast %134 : vector<1x32x32xbf16> to vector<32x32xbf16>
    %136 = arith.truncf %133 : vector<64x32xf32> to vector<64x32xbf16>
    %cst_89 = arith.constant dense<0.000000e+00> : vector<64x32xf32>
    %137 = tpu.matmul %136, %135, %cst_89 {dimension_numbers = #tpu.dot_dimension_numbers<[1], [0], [0], [1], [0, 0, 1, 1], [], []>} : vector<64x32xbf16>, vector<32x32xbf16>, vector<64x32xf32> -> vector<64x32xf32>
    %138 = arith.addf %130, %137 : vector<64x32xf32>
    %c15_90 = arith.constant 15 : index
    %c0_91 = arith.constant 0 : index
    %139 = vector.load %arg20[%c15_90, %c0_91] : memref<96x32xf32, #tpu.memory_space<vmem>>, vector<64x32xf32>
    %140 = vector.broadcast %4 : vector<64x1xf32> to vector<64x32xf32>
    %141 = arith.mulf %139, %140 : vector<64x32xf32>
    %c3_92 = arith.constant 3 : index
    %c0_93 = arith.constant 0 : index
    %c0_94 = arith.constant 0 : index
    %142 = vector.load %arg4[%c3_92, %c0_93, %c0_94] : memref<9x32x32xbf16, #tpu.memory_space<vmem>>, vector<1x32x32xbf16>
    %143 = vector.shape_cast %142 : vector<1x32x32xbf16> to vector<32x32xbf16>
    %144 = arith.truncf %141 : vector<64x32xf32> to vector<64x32xbf16>
    %cst_95 = arith.constant dense<0.000000e+00> : vector<64x32xf32>
    %145 = tpu.matmul %144, %143, %cst_95 {dimension_numbers = #tpu.dot_dimension_numbers<[1], [0], [0], [1], [0, 0, 1, 1], [], []>} : vector<64x32xbf16>, vector<32x32xbf16>, vector<64x32xf32> -> vector<64x32xf32>
    %146 = arith.addf %138, %145 : vector<64x32xf32>
    %c16_96 = arith.constant 16 : index
    %c0_97 = arith.constant 0 : index
    %147 = vector.load %arg20[%c16_96, %c0_97] : memref<96x32xf32, #tpu.memory_space<vmem>>, vector<64x32xf32>
    %c4_98 = arith.constant 4 : index
    %c0_99 = arith.constant 0 : index
    %c0_100 = arith.constant 0 : index
    %148 = vector.load %arg4[%c4_98, %c0_99, %c0_100] : memref<9x32x32xbf16, #tpu.memory_space<vmem>>, vector<1x32x32xbf16>
    %149 = vector.shape_cast %148 : vector<1x32x32xbf16> to vector<32x32xbf16>
    %150 = arith.truncf %147 : vector<64x32xf32> to vector<64x32xbf16>
    %cst_101 = arith.constant dense<0.000000e+00> : vector<64x32xf32>
    %151 = tpu.matmul %150, %149, %cst_101 {dimension_numbers = #tpu.dot_dimension_numbers<[1], [0], [0], [1], [0, 0, 1, 1], [], []>} : vector<64x32xbf16>, vector<32x32xbf16>, vector<64x32xf32> -> vector<64x32xf32>
    %152 = arith.addf %146, %151 : vector<64x32xf32>
    %c17_102 = arith.constant 17 : index
    %c0_103 = arith.constant 0 : index
    %153 = vector.load %arg20[%c17_102, %c0_103] : memref<96x32xf32, #tpu.memory_space<vmem>>, vector<64x32xf32>
    %154 = vector.broadcast %5 : vector<64x1xf32> to vector<64x32xf32>
    %155 = arith.mulf %153, %154 : vector<64x32xf32>
    %c5_104 = arith.constant 5 : index
    %c0_105 = arith.constant 0 : index
    %c0_106 = arith.constant 0 : index
    %156 = vector.load %arg4[%c5_104, %c0_105, %c0_106] : memref<9x32x32xbf16, #tpu.memory_space<vmem>>, vector<1x32x32xbf16>
    %157 = vector.shape_cast %156 : vector<1x32x32xbf16> to vector<32x32xbf16>
    %158 = arith.truncf %155 : vector<64x32xf32> to vector<64x32xbf16>
    %cst_107 = arith.constant dense<0.000000e+00> : vector<64x32xf32>
    %159 = tpu.matmul %158, %157, %cst_107 {dimension_numbers = #tpu.dot_dimension_numbers<[1], [0], [0], [1], [0, 0, 1, 1], [], []>} : vector<64x32xbf16>, vector<32x32xbf16>, vector<64x32xf32> -> vector<64x32xf32>
    %160 = arith.addf %152, %159 : vector<64x32xf32>
    %c23_108 = arith.constant 23 : index
    %c0_109 = arith.constant 0 : index
    %161 = vector.load %arg20[%c23_108, %c0_109] : memref<96x32xf32, #tpu.memory_space<vmem>>, vector<64x32xf32>
    %162 = vector.broadcast %4 : vector<64x1xf32> to vector<64x32xf32>
    %163 = arith.mulf %161, %162 : vector<64x32xf32>
    %c6_110 = arith.constant 6 : index
    %c0_111 = arith.constant 0 : index
    %c0_112 = arith.constant 0 : index
    %164 = vector.load %arg4[%c6_110, %c0_111, %c0_112] : memref<9x32x32xbf16, #tpu.memory_space<vmem>>, vector<1x32x32xbf16>
    %165 = vector.shape_cast %164 : vector<1x32x32xbf16> to vector<32x32xbf16>
    %166 = arith.truncf %163 : vector<64x32xf32> to vector<64x32xbf16>
    %cst_113 = arith.constant dense<0.000000e+00> : vector<64x32xf32>
    %167 = tpu.matmul %166, %165, %cst_113 {dimension_numbers = #tpu.dot_dimension_numbers<[1], [0], [0], [1], [0, 0, 1, 1], [], []>} : vector<64x32xbf16>, vector<32x32xbf16>, vector<64x32xf32> -> vector<64x32xf32>
    %168 = arith.addf %160, %167 : vector<64x32xf32>
    %c24_114 = arith.constant 24 : index
    %c0_115 = arith.constant 0 : index
    %169 = vector.load %arg20[%c24_114, %c0_115] : memref<96x32xf32, #tpu.memory_space<vmem>>, vector<64x32xf32>
    %c7_116 = arith.constant 7 : index
    %c0_117 = arith.constant 0 : index
    %c0_118 = arith.constant 0 : index
    %170 = vector.load %arg4[%c7_116, %c0_117, %c0_118] : memref<9x32x32xbf16, #tpu.memory_space<vmem>>, vector<1x32x32xbf16>
    %171 = vector.shape_cast %170 : vector<1x32x32xbf16> to vector<32x32xbf16>
    %172 = arith.truncf %169 : vector<64x32xf32> to vector<64x32xbf16>
    %cst_119 = arith.constant dense<0.000000e+00> : vector<64x32xf32>
    %173 = tpu.matmul %172, %171, %cst_119 {dimension_numbers = #tpu.dot_dimension_numbers<[1], [0], [0], [1], [0, 0, 1, 1], [], []>} : vector<64x32xbf16>, vector<32x32xbf16>, vector<64x32xf32> -> vector<64x32xf32>
    %174 = arith.addf %168, %173 : vector<64x32xf32>
    %c25_120 = arith.constant 25 : index
    %c0_121 = arith.constant 0 : index
    %175 = vector.load %arg20[%c25_120, %c0_121] : memref<96x32xf32, #tpu.memory_space<vmem>>, vector<64x32xf32>
    %176 = vector.broadcast %5 : vector<64x1xf32> to vector<64x32xf32>
    %177 = arith.mulf %175, %176 : vector<64x32xf32>
    %c8_122 = arith.constant 8 : index
    %c0_123 = arith.constant 0 : index
    %c0_124 = arith.constant 0 : index
    %178 = vector.load %arg4[%c8_122, %c0_123, %c0_124] : memref<9x32x32xbf16, #tpu.memory_space<vmem>>, vector<1x32x32xbf16>
    %179 = vector.shape_cast %178 : vector<1x32x32xbf16> to vector<32x32xbf16>
    %180 = arith.truncf %177 : vector<64x32xf32> to vector<64x32xbf16>
    %cst_125 = arith.constant dense<0.000000e+00> : vector<64x32xf32>
    %181 = tpu.matmul %180, %179, %cst_125 {dimension_numbers = #tpu.dot_dimension_numbers<[1], [0], [0], [1], [0, 0, 1, 1], [], []>} : vector<64x32xbf16>, vector<32x32xbf16>, vector<64x32xf32> -> vector<64x32xf32>
    %182 = arith.addf %174, %181 : vector<64x32xf32>
    %cst_126 = arith.constant dense<0.000000e+00> : vector<32xf32>
    %183 = vector.multi_reduction <add>, %182, %cst_126 [0] : vector<64x32xf32> to vector<32xf32>
    %184 = vector.shape_cast %183 : vector<32xf32> to vector<1x32xf32>
    %cst_127 = arith.constant 1.562500e-02 : f32
    %185 = vector.broadcast %cst_127 : f32 to vector<1x32xf32>
    %186 = arith.mulf %184, %185 : vector<1x32xf32>
    %187 = arith.mulf %182, %182 : vector<64x32xf32>
    %cst_128 = arith.constant dense<0.000000e+00> : vector<32xf32>
    %188 = vector.multi_reduction <add>, %187, %cst_128 [0] : vector<64x32xf32> to vector<32xf32>
    %189 = vector.shape_cast %188 : vector<32xf32> to vector<1x32xf32>
    %cst_129 = arith.constant 1.562500e-02 : f32
    %190 = vector.broadcast %cst_129 : f32 to vector<1x32xf32>
    %191 = arith.mulf %189, %190 : vector<1x32xf32>
    %192 = arith.mulf %186, %186 : vector<1x32xf32>
    %193 = arith.subf %191, %192 : vector<1x32xf32>
    %cst_130 = arith.constant 0.000000e+00 : f32
    %194 = vector.broadcast %cst_130 : f32 to vector<1x32xf32>
    %195 = arith.maximumf %193, %194 : vector<1x32xf32>
    %196 = vector.broadcast %186 : vector<1x32xf32> to vector<64x32xf32>
    %197 = arith.subf %182, %196 : vector<64x32xf32>
    %cst_131 = arith.constant 9.99999974E-6 : f32
    %198 = vector.broadcast %cst_131 : f32 to vector<1x32xf32>
    %199 = arith.addf %195, %198 : vector<1x32xf32>
    %200 = math.rsqrt %199 : vector<1x32xf32>
    %201 = vector.broadcast %200 : vector<1x32xf32> to vector<64x32xf32>
    %202 = arith.mulf %197, %201 : vector<64x32xf32>
    %203 = arith.subf %182, %202 : vector<64x32xf32>
    %204 = arith.addf %203, %105 : vector<64x32xf32>
    %c16_132 = arith.constant 16 : index
    %c0_133 = arith.constant 0 : index
    %205 = vector.load %arg20[%c16_132, %c0_133] : memref<96x32xf32, #tpu.memory_space<vmem>>, vector<64x32xf32>
    tpu.vector_store %arg20[%c16_132, %c0_133], %204 {strides = array<i32>} : memref<96x32xf32, #tpu.memory_space<vmem>>, vector<64x32xf32>,
    %cst_134 = arith.constant 0.000000e+00 : f32
    %206 = vector.broadcast %cst_134 : f32 to vector<64x32xf32>
    %c7_135 = arith.constant 7 : index
    %c0_136 = arith.constant 0 : index
    %207 = vector.load %arg20[%c7_135, %c0_136] : memref<96x32xf32, #tpu.memory_space<vmem>>, vector<64x32xf32>
    %208 = vector.broadcast %4 : vector<64x1xf32> to vector<64x32xf32>
    %209 = arith.mulf %207, %208 : vector<64x32xf32>
    %c0_137 = arith.constant 0 : index
    %c0_138 = arith.constant 0 : index
    %c0_139 = arith.constant 0 : index
    %210 = vector.load %arg5[%c0_137, %c0_138, %c0_139] : memref<9x32x32xbf16, #tpu.memory_space<vmem>>, vector<1x32x32xbf16>
    %211 = vector.shape_cast %210 : vector<1x32x32xbf16> to vector<32x32xbf16>
    %212 = arith.truncf %209 : vector<64x32xf32> to vector<64x32xbf16>
    %cst_140 = arith.constant dense<0.000000e+00> : vector<64x32xf32>
    %213 = tpu.matmul %212, %211, %cst_140 {dimension_numbers = #tpu.dot_dimension_numbers<[1], [0], [0], [1], [0, 0, 1, 1], [], []>} : vector<64x32xbf16>, vector<32x32xbf16>, vector<64x32xf32> -> vector<64x32xf32>
    %214 = arith.addf %206, %213 : vector<64x32xf32>
    %c8_141 = arith.constant 8 : index
    %c0_142 = arith.constant 0 : index
    %215 = vector.load %arg20[%c8_141, %c0_142] : memref<96x32xf32, #tpu.memory_space<vmem>>, vector<64x32xf32>
    %c1_143 = arith.constant 1 : index
    %c0_144 = arith.constant 0 : index
    %c0_145 = arith.constant 0 : index
    %216 = vector.load %arg5[%c1_143, %c0_144, %c0_145] : memref<9x32x32xbf16, #tpu.memory_space<vmem>>, vector<1x32x32xbf16>
    %217 = vector.shape_cast %216 : vector<1x32x32xbf16> to vector<32x32xbf16>
    %218 = arith.truncf %215 : vector<64x32xf32> to vector<64x32xbf16>
    %cst_146 = arith.constant dense<0.000000e+00> : vector<64x32xf32>
    %219 = tpu.matmul %218, %217, %cst_146 {dimension_numbers = #tpu.dot_dimension_numbers<[1], [0], [0], [1], [0, 0, 1, 1], [], []>} : vector<64x32xbf16>, vector<32x32xbf16>, vector<64x32xf32> -> vector<64x32xf32>
    %220 = arith.addf %214, %219 : vector<64x32xf32>
    %c9_147 = arith.constant 9 : index
    %c0_148 = arith.constant 0 : index
    %221 = vector.load %arg20[%c9_147, %c0_148] : memref<96x32xf32, #tpu.memory_space<vmem>>, vector<64x32xf32>
    %222 = vector.broadcast %5 : vector<64x1xf32> to vector<64x32xf32>
    %223 = arith.mulf %221, %222 : vector<64x32xf32>
    %c2_149 = arith.constant 2 : index
    %c0_150 = arith.constant 0 : index
    %c0_151 = arith.constant 0 : index
    %224 = vector.load %arg5[%c2_149, %c0_150, %c0_151] : memref<9x32x32xbf16, #tpu.memory_space<vmem>>, vector<1x32x32xbf16>
    %225 = vector.shape_cast %224 : vector<1x32x32xbf16> to vector<32x32xbf16>
    %226 = arith.truncf %223 : vector<64x32xf32> to vector<64x32xbf16>
    %cst_152 = arith.constant dense<0.000000e+00> : vector<64x32xf32>
    %227 = tpu.matmul %226, %225, %cst_152 {dimension_numbers = #tpu.dot_dimension_numbers<[1], [0], [0], [1], [0, 0, 1, 1], [], []>} : vector<64x32xbf16>, vector<32x32xbf16>, vector<64x32xf32> -> vector<64x32xf32>
    %228 = arith.addf %220, %227 : vector<64x32xf32>
    %c15_153 = arith.constant 15 : index
    %c0_154 = arith.constant 0 : index
    %229 = vector.load %arg20[%c15_153, %c0_154] : memref<96x32xf32, #tpu.memory_space<vmem>>, vector<64x32xf32>
    %230 = vector.broadcast %4 : vector<64x1xf32> to vector<64x32xf32>
    %231 = arith.mulf %229, %230 : vector<64x32xf32>
    %c3_155 = arith.constant 3 : index
    %c0_156 = arith.constant 0 : index
    %c0_157 = arith.constant 0 : index
    %232 = vector.load %arg5[%c3_155, %c0_156, %c0_157] : memref<9x32x32xbf16, #tpu.memory_space<vmem>>, vector<1x32x32xbf16>
    %233 = vector.shape_cast %232 : vector<1x32x32xbf16> to vector<32x32xbf16>
    %234 = arith.truncf %231 : vector<64x32xf32> to vector<64x32xbf16>
    %cst_158 = arith.constant dense<0.000000e+00> : vector<64x32xf32>
    %235 = tpu.matmul %234, %233, %cst_158 {dimension_numbers = #tpu.dot_dimension_numbers<[1], [0], [0], [1], [0, 0, 1, 1], [], []>} : vector<64x32xbf16>, vector<32x32xbf16>, vector<64x32xf32> -> vector<64x32xf32>
    %236 = arith.addf %228, %235 : vector<64x32xf32>
    %c16_159 = arith.constant 16 : index
    %c0_160 = arith.constant 0 : index
    %237 = vector.load %arg20[%c16_159, %c0_160] : memref<96x32xf32, #tpu.memory_space<vmem>>, vector<64x32xf32>
    %c4_161 = arith.constant 4 : index
    %c0_162 = arith.constant 0 : index
    %c0_163 = arith.constant 0 : index
    %238 = vector.load %arg5[%c4_161, %c0_162, %c0_163] : memref<9x32x32xbf16, #tpu.memory_space<vmem>>, vector<1x32x32xbf16>
    %239 = vector.shape_cast %238 : vector<1x32x32xbf16> to vector<32x32xbf16>
    %240 = arith.truncf %237 : vector<64x32xf32> to vector<64x32xbf16>
    %cst_164 = arith.constant dense<0.000000e+00> : vector<64x32xf32>
    %241 = tpu.matmul %240, %239, %cst_164 {dimension_numbers = #tpu.dot_dimension_numbers<[1], [0], [0], [1], [0, 0, 1, 1], [], []>} : vector<64x32xbf16>, vector<32x32xbf16>, vector<64x32xf32> -> vector<64x32xf32>
    %242 = arith.addf %236, %241 : vector<64x32xf32>
    %c17_165 = arith.constant 17 : index
    %c0_166 = arith.constant 0 : index
    %243 = vector.load %arg20[%c17_165, %c0_166] : memref<96x32xf32, #tpu.memory_space<vmem>>, vector<64x32xf32>
    %244 = vector.broadcast %5 : vector<64x1xf32> to vector<64x32xf32>
    %245 = arith.mulf %243, %244 : vector<64x32xf32>
    %c5_167 = arith.constant 5 : index
    %c0_168 = arith.constant 0 : index
    %c0_169 = arith.constant 0 : index
    %246 = vector.load %arg5[%c5_167, %c0_168, %c0_169] : memref<9x32x32xbf16, #tpu.memory_space<vmem>>, vector<1x32x32xbf16>
    %247 = vector.shape_cast %246 : vector<1x32x32xbf16> to vector<32x32xbf16>
    %248 = arith.truncf %245 : vector<64x32xf32> to vector<64x32xbf16>
    %cst_170 = arith.constant dense<0.000000e+00> : vector<64x32xf32>
    %249 = tpu.matmul %248, %247, %cst_170 {dimension_numbers = #tpu.dot_dimension_numbers<[1], [0], [0], [1], [0, 0, 1, 1], [], []>} : vector<64x32xbf16>, vector<32x32xbf16>, vector<64x32xf32> -> vector<64x32xf32>
    %250 = arith.addf %242, %249 : vector<64x32xf32>
    %c23_171 = arith.constant 23 : index
    %c0_172 = arith.constant 0 : index
    %251 = vector.load %arg20[%c23_171, %c0_172] : memref<96x32xf32, #tpu.memory_space<vmem>>, vector<64x32xf32>
    %252 = vector.broadcast %4 : vector<64x1xf32> to vector<64x32xf32>
    %253 = arith.mulf %251, %252 : vector<64x32xf32>
    %c6_173 = arith.constant 6 : index
    %c0_174 = arith.constant 0 : index
    %c0_175 = arith.constant 0 : index
    %254 = vector.load %arg5[%c6_173, %c0_174, %c0_175] : memref<9x32x32xbf16, #tpu.memory_space<vmem>>, vector<1x32x32xbf16>
    %255 = vector.shape_cast %254 : vector<1x32x32xbf16> to vector<32x32xbf16>
    %256 = arith.truncf %253 : vector<64x32xf32> to vector<64x32xbf16>
    %cst_176 = arith.constant dense<0.000000e+00> : vector<64x32xf32>
    %257 = tpu.matmul %256, %255, %cst_176 {dimension_numbers = #tpu.dot_dimension_numbers<[1], [0], [0], [1], [0, 0, 1, 1], [], []>} : vector<64x32xbf16>, vector<32x32xbf16>, vector<64x32xf32> -> vector<64x32xf32>
    %258 = arith.addf %250, %257 : vector<64x32xf32>
    %c24_177 = arith.constant 24 : index
    %c0_178 = arith.constant 0 : index
    %259 = vector.load %arg20[%c24_177, %c0_178] : memref<96x32xf32, #tpu.memory_space<vmem>>, vector<64x32xf32>
    %c7_179 = arith.constant 7 : index
    %c0_180 = arith.constant 0 : index
    %c0_181 = arith.constant 0 : index
    %260 = vector.load %arg5[%c7_179, %c0_180, %c0_181] : memref<9x32x32xbf16, #tpu.memory_space<vmem>>, vector<1x32x32xbf16>
    %261 = vector.shape_cast %260 : vector<1x32x32xbf16> to vector<32x32xbf16>
    %262 = arith.truncf %259 : vector<64x32xf32> to vector<64x32xbf16>
    %cst_182 = arith.constant dense<0.000000e+00> : vector<64x32xf32>
    %263 = tpu.matmul %262, %261, %cst_182 {dimension_numbers = #tpu.dot_dimension_numbers<[1], [0], [0], [1], [0, 0, 1, 1], [], []>} : vector<64x32xbf16>, vector<32x32xbf16>, vector<64x32xf32> -> vector<64x32xf32>
    %264 = arith.addf %258, %263 : vector<64x32xf32>
    %c25_183 = arith.constant 25 : index
    %c0_184 = arith.constant 0 : index
    %265 = vector.load %arg20[%c25_183, %c0_184] : memref<96x32xf32, #tpu.memory_space<vmem>>, vector<64x32xf32>
    %266 = vector.broadcast %5 : vector<64x1xf32> to vector<64x32xf32>
    %267 = arith.mulf %265, %266 : vector<64x32xf32>
    %c8_185 = arith.constant 8 : index
    %c0_186 = arith.constant 0 : index
    %c0_187 = arith.constant 0 : index
    %268 = vector.load %arg5[%c8_185, %c0_186, %c0_187] : memref<9x32x32xbf16, #tpu.memory_space<vmem>>, vector<1x32x32xbf16>
    %269 = vector.shape_cast %268 : vector<1x32x32xbf16> to vector<32x32xbf16>
    %270 = arith.truncf %267 : vector<64x32xf32> to vector<64x32xbf16>
    %cst_188 = arith.constant dense<0.000000e+00> : vector<64x32xf32>
    %271 = tpu.matmul %270, %269, %cst_188 {dimension_numbers = #tpu.dot_dimension_numbers<[1], [0], [0], [1], [0, 0, 1, 1], [], []>} : vector<64x32xbf16>, vector<32x32xbf16>, vector<64x32xf32> -> vector<64x32xf32>
    %272 = arith.addf %264, %271 : vector<64x32xf32>
    %c0_189 = arith.constant 0 : index
    %c0_190 = arith.constant 0 : index
    %273 = vector.load %arg11[%c0_189, %c0_190] : memref<1x32xf32, #tpu.memory_space<vmem>>, vector<1x32xf32>
    %274 = vector.broadcast %273 : vector<1x32xf32> to vector<64x32xf32>
    %275 = arith.mulf %272, %274 : vector<64x32xf32>
    %c0_191 = arith.constant 0 : index
    %c0_192 = arith.constant 0 : index
    %276 = vector.load %arg12[%c0_191, %c0_192] : memref<1x32xf32, #tpu.memory_space<vmem>>, vector<1x32xf32>
    %277 = vector.broadcast %276 : vector<1x32xf32> to vector<64x32xf32>
    %278 = arith.addf %275, %277 : vector<64x32xf32>
    %cst_193 = arith.constant 0.000000e+00 : f32
    %279 = vector.broadcast %cst_193 : f32 to vector<64x32xf32>
    %280 = arith.maximumf %278, %279 : vector<64x32xf32>
    %281 = arith.addf %202, %280 : vector<64x32xf32>
    %c0_194 = arith.constant 0 : index
    %c0_195 = arith.constant 0 : index
    %282 = vector.load %arg13[%c0_194, %c0_195] : memref<1x32xf32, #tpu.memory_space<vmem>>, vector<1x32xf32>
    %283 = vector.broadcast %282 : vector<1x32xf32> to vector<64x32xf32>
    %284 = arith.mulf %281, %283 : vector<64x32xf32>
    %c0_196 = arith.constant 0 : index
    %c0_197 = arith.constant 0 : index
    %285 = vector.load %arg14[%c0_196, %c0_197] : memref<1x32xf32, #tpu.memory_space<vmem>>, vector<1x32xf32>
    %286 = vector.broadcast %285 : vector<1x32xf32> to vector<64x32xf32>
    %287 = arith.addf %284, %286 : vector<64x32xf32>
    %cst_198 = arith.constant 0.000000e+00 : f32
    %288 = vector.broadcast %cst_198 : f32 to vector<64x32xf32>
    %289 = arith.maximumf %287, %288 : vector<64x32xf32>
    %c0_199 = arith.constant 0 : index
    %c0_200 = arith.constant 0 : index
    %290 = vector.load %arg6[%c0_199, %c0_200] : memref<32x128xbf16, #tpu.memory_space<vmem>>, vector<32x128xbf16>
    %291 = arith.truncf %289 : vector<64x32xf32> to vector<64x32xbf16>
    %cst_201 = arith.constant dense<0.000000e+00> : vector<64x128xf32>
    %292 = tpu.matmul %291, %290, %cst_201 {dimension_numbers = #tpu.dot_dimension_numbers<[1], [0], [0], [1], [0, 0, 1, 1], [], []>} : vector<64x32xbf16>, vector<32x128xbf16>, vector<64x128xf32> -> vector<64x128xf32>
    %c0_202 = arith.constant 0 : index
    %c0_203 = arith.constant 0 : index
    %293 = vector.load %arg15[%c0_202, %c0_203] : memref<1x128xf32, #tpu.memory_space<vmem>>, vector<1x128xf32>
    %294 = vector.broadcast %293 : vector<1x128xf32> to vector<64x128xf32>
    %295 = arith.mulf %292, %294 : vector<64x128xf32>
    %c0_204 = arith.constant 0 : index
    %c0_205 = arith.constant 0 : index
    %296 = vector.load %arg16[%c0_204, %c0_205] : memref<1x128xf32, #tpu.memory_space<vmem>>, vector<1x128xf32>
    %297 = vector.broadcast %296 : vector<1x128xf32> to vector<64x128xf32>
    %298 = arith.addf %295, %297 : vector<64x128xf32>
    %299 = arith.addf %298, %3 : vector<64x128xf32>
    %cst_206 = arith.constant 0.000000e+00 : f32
    %300 = vector.broadcast %cst_206 : f32 to vector<64x128xf32>
    %301 = arith.maximumf %299, %300 : vector<64x128xf32>
    %c0_207 = arith.constant 0 : index
    %c0_208 = arith.constant 0 : index
    %c0_209 = arith.constant 0 : index
    %302 = vector.load %arg19[%c0_207, %c0_208, %c0_209] : memref<1x64x128xf32, #tpu.memory_space<vmem>>, vector<1x64x128xf32>
    %303 = vector.shape_cast %302 : vector<1x64x128xf32> to vector<64x128xf32>
    %304 = vector.shape_cast %301 : vector<64x128xf32> to vector<1x64x128xf32>
    tpu.vector_store %arg19[%c0_207, %c0_208, %c0_209], %304 {strides = array<i32>} : memref<1x64x128xf32, #tpu.memory_space<vmem>>, vector<1x64x128xf32>,
    return
  }
  func.func @transform_0(%arg0: i32) -> (i32, i32, i32) {
    %c0_i32 = arith.constant 0 : i32
    %c0_i32_0 = arith.constant 0 : i32
    %c0_i32_1 = arith.constant 0 : i32
    return %arg0, %c0_i32, %c0_i32_0 : i32, i32, i32
  }
  func.func @transform_1(%arg0: i32) -> (i32, i32) {
    %c0_i32 = arith.constant 0 : i32
    %c0_i32_0 = arith.constant 0 : i32
    %c0_i32_1 = arith.constant 0 : i32
    return %c0_i32, %c0_i32_0 : i32, i32
  }
  func.func @transform_2(%arg0: i32) -> (i32, i32, i32) {
    %c0_i32 = arith.constant 0 : i32
    %c0_i32_0 = arith.constant 0 : i32
    %c0_i32_1 = arith.constant 0 : i32
    %c0_i32_2 = arith.constant 0 : i32
    return %c0_i32, %c0_i32_0, %c0_i32_1 : i32, i32, i32
  }
  func.func @transform_3(%arg0: i32) -> (i32, i32, i32) {
    %c0_i32 = arith.constant 0 : i32
    %c0_i32_0 = arith.constant 0 : i32
    %c0_i32_1 = arith.constant 0 : i32
    %c0_i32_2 = arith.constant 0 : i32
    return %c0_i32, %c0_i32_0, %c0_i32_1 : i32, i32, i32
  }
  func.func @transform_4(%arg0: i32) -> (i32, i32, i32) {
    %c0_i32 = arith.constant 0 : i32
    %c0_i32_0 = arith.constant 0 : i32
    %c0_i32_1 = arith.constant 0 : i32
    %c0_i32_2 = arith.constant 0 : i32
    return %c0_i32, %c0_i32_0, %c0_i32_1 : i32, i32, i32
  }
  func.func @transform_5(%arg0: i32) -> (i32, i32) {
    %c0_i32 = arith.constant 0 : i32
    %c0_i32_0 = arith.constant 0 : i32
    %c0_i32_1 = arith.constant 0 : i32
    return %c0_i32, %c0_i32_0 : i32, i32
  }
  func.func @transform_6(%arg0: i32) -> (i32, i32) {
    %c0_i32 = arith.constant 0 : i32
    %c0_i32_0 = arith.constant 0 : i32
    %c0_i32_1 = arith.constant 0 : i32
    return %c0_i32, %c0_i32_0 : i32, i32
  }
  func.func @transform_7(%arg0: i32) -> (i32, i32) {
    %c0_i32 = arith.constant 0 : i32
    %c0_i32_0 = arith.constant 0 : i32
    %c0_i32_1 = arith.constant 0 : i32
    return %c0_i32, %c0_i32_0 : i32, i32
  }
  func.func @transform_8(%arg0: i32) -> (i32, i32) {
    %c0_i32 = arith.constant 0 : i32
    %c0_i32_0 = arith.constant 0 : i32
    %c0_i32_1 = arith.constant 0 : i32
    return %c0_i32, %c0_i32_0 : i32, i32
  }
  func.func @transform_9(%arg0: i32) -> (i32, i32) {
    %c0_i32 = arith.constant 0 : i32
    %c0_i32_0 = arith.constant 0 : i32
    %c0_i32_1 = arith.constant 0 : i32
    return %c0_i32, %c0_i32_0 : i32, i32
  }
  func.func @transform_10(%arg0: i32) -> (i32, i32) {
    %c0_i32 = arith.constant 0 : i32
    %c0_i32_0 = arith.constant 0 : i32
    %c0_i32_1 = arith.constant 0 : i32
    return %c0_i32, %c0_i32_0 : i32, i32
  }
  func.func @transform_11(%arg0: i32) -> (i32, i32) {
    %c0_i32 = arith.constant 0 : i32
    %c0_i32_0 = arith.constant 0 : i32
    %c0_i32_1 = arith.constant 0 : i32
    return %c0_i32, %c0_i32_0 : i32, i32
  }
  func.func @transform_12(%arg0: i32) -> (i32, i32) {
    %c0_i32 = arith.constant 0 : i32
    %c0_i32_0 = arith.constant 0 : i32
    %c0_i32_1 = arith.constant 0 : i32
    return %c0_i32, %c0_i32_0 : i32, i32
  }
  func.func @transform_13(%arg0: i32) -> (i32, i32) {
    %c0_i32 = arith.constant 0 : i32
    %c0_i32_0 = arith.constant 0 : i32
    %c0_i32_1 = arith.constant 0 : i32
    return %c0_i32, %c0_i32_0 : i32, i32
  }
  func.func @transform_14(%arg0: i32) -> (i32, i32) {
    %c0_i32 = arith.constant 0 : i32
    %c0_i32_0 = arith.constant 0 : i32
    %c0_i32_1 = arith.constant 0 : i32
    return %c0_i32, %c0_i32_0 : i32, i32
  }
  func.func @transform_15(%arg0: i32) -> (i32, i32) {
    %c0_i32 = arith.constant 0 : i32
    %c0_i32_0 = arith.constant 0 : i32
    %c0_i32_1 = arith.constant 0 : i32
    return %c0_i32, %c0_i32_0 : i32, i32
  }
  func.func @transform_16(%arg0: i32) -> (i32, i32) {
    %c0_i32 = arith.constant 0 : i32
    %c0_i32_0 = arith.constant 0 : i32
    %c0_i32_1 = arith.constant 0 : i32
    return %c0_i32, %c0_i32_0 : i32, i32
  }
  func.func @transform_17(%arg0: i32) -> (i32, i32) {
    %c0_i32 = arith.constant 0 : i32
    %c0_i32_0 = arith.constant 0 : i32
    %c0_i32_1 = arith.constant 0 : i32
    return %c0_i32, %c0_i32_0 : i32, i32
  }
  func.func @transform_18(%arg0: i32) -> (i32, i32, i32) {
    %c0_i32 = arith.constant 0 : i32
    %c0_i32_0 = arith.constant 0 : i32
    %c0_i32_1 = arith.constant 0 : i32
    return %arg0, %c0_i32, %c0_i32_0 : i32, i32, i32
  }
}

</mosaic_0001>

<bundles_post_ra>
// kernel: snr2_bottleneck_forward.1
= control target key start
LH: loop header
LB: loop body
LE: loop exit
PB: predicated region body
PF: predicated region fallthrough
CT: control target
= control target key end

     0   :  { %s7304_s0 = inlined_call_operand.vmem [shape: f32[2,64,128], index: 0, kind: input, shape index: {}]   ;;  %s7305_s1 = inlined_call_operand.vmem [shape: bf16[128,32], index: 1, kind: input, shape index: {}]   ;;  %s7306_s2 = inlined_call_operand.vmem [shape: bf16[9,32,32], index: 2, kind: input, shape index: {}]   ;;  %s7307_s3 = inlined_call_operand.vmem [shape: bf16[9,32,32], index: 3, kind: input, shape index: {}]   ;;  %s7308_s4 = inlined_call_operand.vmem [shape: bf16[9,32,32], index: 4, kind: input, shape index: {}]   ;;  %s7309_s5 = inlined_call_operand.vmem [shape: bf16[32,128], index: 5, kind: input, shape index: {}]   ;;  %s7310_s6 = inlined_call_operand.vmem [shape: f32[1,32], index: 6, kind: input, shape index: {}]   ;;  %s7311_s7 = inlined_call_operand.vmem [shape: f32[1,32], index: 7, kind: input, shape index: {}]   ;;  %s7312_s8 = inlined_call_operand.vmem [shape: f32[1,32], index: 8, kind: input, shape index: {}]   ;;  %s7313_s9 = inlined_call_operand.vmem [shape: f32[1,32], index: 9, kind: input, shape index: {}]   ;;  %s7314_s10 = inlined_call_operand.vmem [shape: f32[1,32], index: 10, kind: input, shape index: {}]   ;;  %s7315_s11 = inlined_call_operand.vmem [shape: f32[1,32], index: 11, kind: input, shape index: {}]   ;;  %s7316_s12 = inlined_call_operand.vmem [shape: f32[1,32], index: 12, kind: input, shape index: {}]   ;;  %s7317_s13 = inlined_call_operand.vmem [shape: f32[1,32], index: 13, kind: input, shape index: {}]   ;;  %s7318_s14 = inlined_call_operand.vmem [shape: f32[1,128], index: 14, kind: input, shape index: {}]   ;;  %s7319_s15 = inlined_call_operand.vmem [shape: f32[1,128], index: 15, kind: input, shape index: {}]   ;;  %s7320_s16 = inlined_call_operand.vmem [shape: f32[64,1], index: 16, kind: input, shape index: {}]   ;;  %s7321_s17 = inlined_call_operand.vmem [shape: f32[64,1], index: 17, kind: input, shape index: {}]   ;;  %s7322_s18 = inlined_call_operand.hbm [shape: f32[2,64,128], index: 18, kind: output, shape index: {}]  }
   0x1   :  { %7345 = sst [smem:[#allocation20_spill]] %s7304_s0 }
   0x2   :  { %7346 = sst [smem:[#allocation21_spill]] %s7305_s1 }
   0x3   :  { %7347 = sst [smem:[#allocation22_spill]] %s7306_s2 }
   0x4   :  { %23 = vsyncpa [#allocation4], 0 }
   0x5   :  { %25 = vsyncpa [#allocation4 + $0x1], 0  ;;  %s5898_s27 = smov 0   ;;  %s5900_s28 = smov 0  }
   0x6   :  { %s5902_s29 = smov 0   ;;  %s5904_s30 = smov 0  }
   0x7 LB: > { %7348 = sst [smem:[#allocation6_spill]] %s5784_s27  ;;  %s5919_s0 = sadd.s32 4294967295, %s5796_s30   ;;  %s5796_s30 = sphi %s5904_s30, %s7389_s30   ;;  %s5792_s29 = sphi %s5902_s29, %s7391_s29   ;;  %s5788_s28 = sphi %s5900_s28, %s7393_s28   ;;  %s5784_s27 = sphi %s5898_s27, %s7392_s27  }
   0x8   : > { %7349 = sst [smem:[#allocation7_spill]] %s5792_s29  ;;  %s4585_s19 = sadd.s32 4294967294, %s5796_s30  }
   0x9   : > { %7350 = sst [smem:[#allocation8_spill]] %s5796_s30  ;;  %s5923_s1 = sadd.s32 1, %s5796_s30  }
   0xa   : > { %7351 = sst [smem:[#allocation9_spill]] %s5923_s1  ;;  %s421_s20 = sadd.s32 1, %s5792_s29 }
   0xb   : > { %s418_s21 = ssub.s32 %s5796_s30, %s5923_s1  ;;  %p431_p0 = scmp.ne.s32.totalorder %s5792_s29, %s5788_s28 }
   0xc   : > { %p419_p1 = scmp.eq.s32.totalorder %s418_s21, 0  ;;  %p432_p2 = scmp.eq.s32.totalorder %s5919_s0, 1 }
   0xd   : > { %p437_p3 = scmp.ne.s32.totalorder %s5788_s28, %s5784_s27  ;;  %p438_p4 = scmp.eq.s32.totalorder %s4585_s19, 1 }
   0xe   : > { %s5934_s22 = scalar_select %p419_p1, %s5792_s29, %s421_s20  }
   0xf   : > { %p5936_p5 = por %p432_p2, %p431_p0  ;;  %p5940_p6 = por %p438_p4, %p437_p3 }
  0x10   : > { %7352 = sst [smem:[#allocation10_spill]] %s5934_s22  ;;  %p4588_p7 = scmp.ge.s32.totalorder %s5796_s30, 1 }
  0x11   : > { %s7354_s23 = scalar_select %p5940_p6, 1, 0 }
  0x12   : > { %p515_p8 = scmp.lt.s32.totalorder %s5796_s30, 3 }
  0x13   : > { %7355 = sst [smem:[#allocation11_spill]] %s7354_s23 }
  0x14   : > { %p516_p9 = pnand %p4588_p7, %p515_p8 }
  0x16   : > { %519 = sbr.rel (%p516_p9) target bundleno = 1686 (0x696), region = 92 }
  0x1d   : > { %s7356_s26 = sld [smem:[#allocation21_spill]]  ;;  %p569_p10 = scmp.lt.s32.totalorder %s5919_s0, 1  ;;  %v5798_v2 = vmov 0   ;;  %v596_v8 = vld [vmem:[%s7320_s16] sm:$0xff]  ;;  %v598_v9 = vld [vmem:[%s7320_s16 + $0x10] sm:$0xff]  ;;  %v597_v11 = vld [vmem:[%s7320_s16 + $0x8] sm:$0xff] }
  0x1e   : > { %5656 = vset.pattern.permute.xlu0 %v5798_v2  ;;  %5657 = vset.pattern.permute.xlu1 %v5798_v2  ;;  %s7357_s23 = sld [smem:[#allocation20_spill]]  ;;  %v599_v12 = vld [vmem:[%s7320_s16 + $0x18] sm:$0xff]  ;;  %v600_v14 = vld [vmem:[%s7320_s16 + $0x20] sm:$0xff]  ;;  %v601_v15 = vld [vmem:[%s7320_s16 + $0x28] sm:$0xff]  ;;  %vm575_vm0 = vcmask 261120   ;;  %v5799_v37 = vmov 0.0  }
  0x1f   : > { %s570_s21 = scalar_select %p569_p10, %s5919_s0, 1  ;;  %844 = vperm.xlu0 %5656, %v596_v8   ;;  %854 = vperm.xlu1 %5657, %v598_v9   ;;  %v602_v17 = vld [vmem:[%s7320_s16 + $0x30] sm:$0xff]  ;;  %v603_v18 = vld [vmem:[%s7320_s16 + $0x38] sm:$0xff]  ;;  %v604_v20 = vld [vmem:[%s7321_s17] sm:$0xff]  ;;  %583 = vst.msk [vmem:[#allocation2 + $0x38] sm:$0xff] %vm575_vm0, %v5799_v37 }
  0x20   : > { %v605_v21 = vld [vmem:[%s7321_s17 + $0x8] sm:$0xff]  ;;  %v606_v26 = vld [vmem:[%s7321_s17 + $0x10] sm:$0xff]  ;;  %v607_v27 = vld [vmem:[%s7321_s17 + $0x18] sm:$0xff]  ;;  %576 = vst.msk [vmem:[#allocation2] sm:$0xff] %vm575_vm0, %v5799_v37  ;;  %s7358_s1 = sld [smem:[#allocation22_spill]]  ;;  %s4880_s20 = sshll.u32 %s5919_s0, 10 }
  0x21   : > { %s4879_s24 = sshll.u32 %s570_s21, 6  ;;  %v608_v30 = vld [vmem:[%s7321_s17 + $0x20] sm:$0xff]  ;;  %v609_v31 = vld [vmem:[%s7321_s17 + $0x28] sm:$0xff]  ;;  %v610_v34 = vld [vmem:[%s7321_s17 + $0x30] sm:$0xff]  ;;  %577 = vst.msk [vmem:[#allocation2 + $0x8] sm:$0xff] %vm575_vm0, %v5799_v37  ;;  %s566_s21 = sand.u32 1, %s5788_s28  }
  0x22   : > { %v611_v35 = vld [vmem:[%s7321_s17 + $0x38] sm:$0xff]  ;;  %578 = vst.msk [vmem:[#allocation2 + $0x10] sm:$0xff] %vm575_vm0, %v5799_v37  ;;  %579 = vst.msk [vmem:[#allocation2 + $0x18] sm:$0xff] %vm575_vm0, %v5799_v37  ;;  %s4589_s19 = sshll.u32 %s566_s21, 6  ;;  %s7263_s0 = scalar_lea.sflag [#allocation4], %s566_s21 }
  0x23   : > { %v5658_v0 = vld [vmem:[%s7356_s26] sm:$0xff]   ;;  %v5659_v1 = vld [vmem:[%s7356_s26 + $0x8] sm:$0xff]   ;;  %v5660_v3 = vld [vmem:[%s7356_s26 + $0x10] sm:$0xff]   ;;  %849 = vperm.xlu0 %5656, %v597_v11   ;;  %859 = vperm.xlu1 %5657, %v599_v12   ;;  %580 = vst.msk [vmem:[#allocation2 + $0x20] sm:$0xff] %vm575_vm0, %v5799_v37  ;;  %s7238_s30 = scalar_lea.vmem [#allocation3], %s4589_s19  ;;  %s5800_s25 = smov [#allocation3]  }
  0x24   : > { %5061 = vmatprep.subr.bf16.mxu0 %v5658_v0  ;;  %s5960_s27 = scalar_lea.vmem %s7357_s23, %s4879_s24  ;;  %v5661_v4 = vld [vmem:[%s7356_s26 + $0x18] sm:$0xff]   ;;  %v5662_v10 = vld [vmem:[%s7356_s26 + $0x20] sm:$0xff]   ;;  %v5663_v13 = vld [vmem:[%s7356_s26 + $0x28] sm:$0xff]   ;;  %581 = vst.msk [vmem:[#allocation2 + $0x28] sm:$0xff] %vm575_vm0, %v5799_v37  ;;  %s4523_s29 = sshll.u32 %s7238_s30, 4  ;;  %s7256_s29 = int_to_ptr.vmem [resolvable:$true] %s4523_s29 }
  0x25   : > { %5062 = vmatpush3.bf16.msra.mxu0 %v5658_v0  ;;  %v588_v5 = vld [vmem:[%s5960_s27] sm:$0xff]  ;;  %v589_v6 = vld [vmem:[%s5960_s27 + $0x8] sm:$0xff]  ;;  %v5664_v16 = vld [vmem:[%s7356_s26 + $0x30] sm:$0xff]   ;;  %582 = vst.msk [vmem:[#allocation2 + $0x30] sm:$0xff] %vm575_vm0, %v5799_v37  ;;  %s7254_s24 = scalar_lea.hbm %s7322_s18, %s4880_s20  ;;  %s5738_s19 = sshll.u32 %s5800_s25, 4  ;;  %s5739_s19 = int_to_ptr.vmem [resolvable:$false] %s5738_s19 }
  0x26   : > { %5063 = vmatprep.subr.bf16.mxu0 %v5659_v1  ;;  %v628_v7 = vpack.c.bf16 %v589_v6, %v588_v5  ;;  %v5665_v19 = vld [vmem:[%s7356_s26 + $0x38] sm:$0xff]   ;;  %v590_v22 = vld [vmem:[%s5960_s27 + $0x10] sm:$0xff]  ;;  %v592_v24 = vld [vmem:[%s5960_s27 + $0x20] sm:$0xff]  ;;  %584 = vst.msk [vmem:[#allocation2 + $0x40] sm:$0xff] %vm575_vm0, %v5799_v37  ;;  %s5740_s20 = scalar_lea.vmem %s5739_s19, 2048  ;;  %p5741_p0 = scmp.lt.s32.totalorder %s7256_s29, %s5739_s19 }
  0x27   : > { %864 = vperm.xlu0 %5656, %v600_v14   ;;  %869 = vperm.xlu1 %5657, %v601_v15   ;;  %v591_v23 = vld [vmem:[%s5960_s27 + $0x18] sm:$0xff]  ;;  %v593_v25 = vld [vmem:[%s5960_s27 + $0x28] sm:$0xff]  ;;  %v594_v32 = vld [vmem:[%s5960_s27 + $0x30] sm:$0xff]  ;;  %585 = vst.msk [vmem:[#allocation2 + $0x48] sm:$0xff] %vm575_vm0, %v5799_v37 }
  0x28   : > { %5077 = vmatprep.mubr.bf16.mxu0 %v628_v7  ;;  %v629_v28 = vpack.c.bf16 %v591_v23, %v590_v22  ;;  %v630_v29 = vpack.c.bf16 %v593_v25, %v592_v24  ;;  %v595_v33 = vld [vmem:[%s5960_s27 + $0x38] sm:$0xff]  ;;  %586 = vst.msk [vmem:[#allocation2 + $0x50] sm:$0xff] %vm575_vm0, %v5799_v37  ;;  %587 = vst.msk [vmem:[#allocation2 + $0x58] sm:$0xff] %vm575_vm0, %v5799_v37  ;;  %v5666_v38 = vld [vmem:[%s7358_s1 + $0x10] sm:$0xff]  }
  0x29   : > { %5064 = vmatpush3.bf16.msra.mxu0 %v5659_v1  ;;  %v631_v36 = vpack.c.bf16 %v595_v33, %v594_v32  ;;  %v5667_v39 = vld [vmem:[%s7358_s1 + $0x30] sm:$0xff]   ;;  %v5668_v40 = vld [vmem:[%s7358_s1 + $0x18] sm:$0xff]   ;;  %v6060_v42 = vld [vmem:[%s7358_s1 + $0x40] sm:$0xff]  }
  0x2a   : > { %5065 = vmatprep.subr.bf16.mxu0 %v5660_v3  ;;  %v5669_v41 = vld [vmem:[%s7358_s1 + $0x38] sm:$0xff]   ;;  %5121 = vmatprep.subr.bf16.mxu1 %v5667_v39  ;;  %v6066_v43 = vld [vmem:[%s7358_s1] sm:$0xff]  }
  0x2b   : > { %874 = vperm.xlu0 %5656, %v602_v17   ;;  %879 = vperm.xlu1 %5657, %v603_v18  }
  0x2c   : > { %5122 = vmatpush3.bf16.msra.mxu1 %v5667_v39 }
  0x2d   : > { %5066 = vmatpush3.bf16.msra.mxu0 %v5660_v3  ;;  %5123 = vmatprep.subr.bf16.mxu1 %v5669_v41 }
  0x2e   : > { %5067 = vmatprep.subr.bf16.mxu0 %v5661_v4 }
  0x2f   : > { %1103 = vperm.xlu0 %5656, %v604_v20   ;;  %1108 = vperm.xlu1 %5657, %v605_v21  }
  0x30   : > { %5124 = vmatpush3.bf16.msra.mxu1 %v5669_v41 }
  0x31   : > { %5068 = vmatpush3.bf16.msra.mxu0 %v5661_v4  ;;  %5133 = vmatprep.subr.bf16.mxu1 %v6060_v42 }
  0x32   : > { %5069 = vmatprep.subr.bf16.mxu0 %v5662_v10 }
  0x33   : > { %1113 = vperm.xlu0 %5656, %v606_v26   ;;  %1118 = vperm.xlu1 %5657, %v607_v27  }
  0x35   : > { %5070 = vmatpush3.bf16.msra.mxu0 %v5662_v10 }
  0x36   : > { %5071 = vmatprep.subr.bf16.mxu0 %v5663_v13 }
  0x37   : > { %1123 = vperm.xlu0 %5656, %v608_v30   ;;  %1128 = vperm.xlu1 %5657, %v609_v31  }
  0x39   : > { %5072 = vmatpush3.bf16.msra.mxu0 %v5663_v13 }
  0x3a   : > { %5073 = vmatprep.subr.bf16.mxu0 %v5664_v16 }
  0x3b   : > { %1133 = vperm.xlu0 %5656, %v610_v34   ;;  %1138 = vperm.xlu1 %5657, %v611_v35  }
  0x3d   : > { %5074 = vmatpush3.bf16.msra.mxu0 %v5664_v16 }
  0x3e   : > { %5075 = vmatprep.subr.bf16.mxu0 %v5665_v19 }
  0x41   : > { %5076 = vmatpush3.bf16.msra.mxu0 %v5665_v19 }
  0x42   : > { %5085 = vmatprep.subr.bf16.mxu0 %v5666_v38 }
  0x44   : > { %5078 = vmatmul.mubr.bf16.vlgmr.msra.gmra.mrb[0].mxu0 %v629_v28 }
  0x45   : > { %5081 = vmatprep.mubr.bf16.mxu0 %v630_v29  ;;  %5086 = vmatpush3.bf16.msra.mxu0 %v5666_v38 }
  0x46   : > { %5087 = vmatprep.subr.bf16.mxu0 %v5668_v40 }
  0x49   : > { %5088 = vmatpush3.bf16.msra.mxu0 %v5668_v40 }
  0x4a   : > { %5097 = vmatprep.subr.bf16.mxu0 %v6066_v43 }
  0x4c   : > { %5082 = vmatmul.mubr.bf16.gmra.mrb[4].mxu0 %v631_v36 }
 0x117   : > { %v6069_v44 = vpop.f32.mrb[0].mxu0 }
 0x118   : > { %v6071_v45 = vpop.f32.mrb[1].mxu0  ;;  %v769_v49 = vmul.f32 %v6069_v44, %v6069_v44  ;;  %v748_v54 = vsel %vm575_vm0, %v6069_v44, 0.0 }
 0x119   : > { %v767_v46 = vmul.f32 %v6071_v45, %v6071_v45  ;;  %v6075_v47 = vpop.f32.mrb[2].mxu0  ;;  %v745_v50 = vsel %vm575_vm0, %v6071_v45, 0.0 }
 0x11a   : > { %v6077_v48 = vpop.f32.mrb[3].mxu0  ;;  %v770_v56 = vmul.f32 %v6075_v47, %v6075_v47  ;;  %v778_v60 = vsel %vm575_vm0, %v769_v49, 0.0  ;;  %v750_v61 = vsel %vm575_vm0, %v6075_v47, 0.0 }
 0x11b   : > { %v746_v51 = vsel %vm575_vm0, %v6077_v48, 0.0  ;;  %v768_v52 = vmul.f32 %v6077_v48, %v6077_v48  ;;  %v775_v55 = vsel %vm575_vm0, %v767_v46, 0.0 }
 0x11c   : > { %v747_v53 = vadd.f32 %v746_v51, %v745_v50  ;;  %v780_v2 = vsel %vm575_vm0, %v770_v56, 0.0 }
 0x11d   : > { %v776_v57 = vsel %vm575_vm0, %v768_v52, 0.0 }
 0x11e   : > { %v749_v58 = vadd.f32 %v748_v54, %v747_v53  ;;  %v777_v59 = vadd.f32 %v776_v57, %v775_v55 }
 0x11f   : > { %v6096_v62 = vpop.f32.mrb[4].mxu0 }
 0x120   : > { %v779_v63 = vadd.f32 %v778_v60, %v777_v59  ;;  %v6098_v0 = vpop.f32.mrb[5].mxu0  ;;  %v751_v1 = vadd.f32 %v750_v61, %v749_v58  ;;  %v773_v9 = vmul.f32 %v6096_v62, %v6096_v62  ;;  %v756_v15 = vsel %vm575_vm0, %v6096_v62, 0.0 }
 0x121   : > { %v752_v3 = vsel %vm575_vm0, %v6098_v0, 0.0  ;;  %v771_v4 = vmul.f32 %v6098_v0, %v6098_v0  ;;  %v6105_v5 = vpop.f32.mrb[6].mxu0 }
 0x122   : > { %v753_v6 = vadd.f32 %v752_v3, %v751_v1  ;;  %v781_v7 = vadd.f32 %v780_v2, %v779_v63  ;;  %v6107_v8 = vpop.f32.mrb[7].mxu0  ;;  %v774_v16 = vmul.f32 %v6105_v5, %v6105_v5  ;;  %v786_v20 = vsel %vm575_vm0, %v773_v9, 0.0  ;;  %v6153_v9 = vpop.permute.xlu1 %854 }
 0x123   : > { %v782_v10 = vsel %vm575_vm0, %v771_v4, 0.0  ;;  %v754_v11 = vsel %vm575_vm0, %v6107_v8, 0.0  ;;  %v772_v12 = vmul.f32 %v6107_v8, %v6107_v8  ;;  %v758_v21 = vsel %vm575_vm0, %v6105_v5, 0.0 }
 0x124   : > { %v783_v13 = vadd.f32 %v782_v10, %v781_v7  ;;  %v755_v14 = vadd.f32 %v754_v11, %v753_v6  ;;  %v788_v24 = vsel %vm575_vm0, %v774_v16, 0.0  ;;  %v6151_v7 = vpop.permute.xlu0 %844 }
 0x125   : > { %v784_v17 = vsel %vm575_vm0, %v772_v12, 0.0 }
 0x126   : > { %v757_v18 = vadd.f32 %v756_v15, %v755_v14  ;;  %v785_v19 = vadd.f32 %v784_v17, %v783_v13 }
 0x128   : > { %v759_v22 = vadd.f32 %v758_v21, %v757_v18  ;;  %v787_v23 = vadd.f32 %v786_v20, %v785_v19 }
 0x12a   : > { %v760_v25 = vrot.slane %v759_v22, 4  ;;  %v789_v26 = vadd.f32 %v788_v24, %v787_v23 }
 0x12c   : > { %v761_v27 = vadd.f32 %v760_v25, %v759_v22  ;;  %v790_v28 = vrot.slane %v789_v26, 4 }
 0x12e   : > { %v762_v29 = vrot.slane %v761_v27, 2  ;;  %v791_v30 = vadd.f32 %v790_v28, %v789_v26 }
 0x130   : > { %v763_v31 = vadd.f32 %v762_v29, %v761_v27  ;;  %v792_v32 = vrot.slane %v791_v30, 2 }
 0x132   : > { %v764_v33 = vrot.slane %v763_v31, 1  ;;  %v793_v34 = vadd.f32 %v792_v32, %v791_v30 }
 0x134   : > { %v765_v35 = vadd.f32 %v764_v33, %v763_v31  ;;  %v794_v36 = vrot.slane %v793_v34, 1 }
 0x136   : > { %v766_v37 = vmul.f32 0.015625, %v765_v35  ;;  %v795_v38 = vadd.f32 %v794_v36, %v793_v34 }
 0x138   : > { %v796_v39 = vmul.f32 0.015625, %v795_v38  ;;  %v797_v40 = vmul.f32 %v766_v37, %v766_v37  ;;  %v801_v41 = vsub.f32 %v6077_v48, %v766_v37  ;;  %v802_v46 = vsub.f32 %v6069_v44, %v766_v37 }
 0x139   : > { %v805_v49 = vsub.f32 %v6107_v8, %v766_v37  ;;  %v800_v50 = vsub.f32 %v6071_v45, %v766_v37  ;;  %v803_v51 = vsub.f32 %v6075_v47, %v766_v37  ;;  %v804_v52 = vsub.f32 %v6098_v0, %v766_v37 }
 0x13a   : > { %v798_v53 = vsub.f32 %v796_v39, %v797_v40  ;;  %v806_v54 = vsub.f32 %v6096_v62, %v766_v37  ;;  %v807_v55 = vsub.f32 %v6105_v5, %v766_v37  ;;  %v834_v37 = vld [vmem:[#allocation2 + $0x7] sm:$0xff] }
 0x13b   : > { %v5672_v39 = vld [vmem:[%s7358_s1 + $0x48] sm:$0xff]   ;;  %v5675_v40 = vld [vmem:[%s7358_s1 + $0x20] sm:$0xff]  }
 0x13c   : > { %v799_v56 = vmax.f32 %v798_v53, 0.0  ;;  %v6259_v53 = vmul.f32 %v6151_v7, %v834_v37 }
 0x13e   : > { %v808_v57 = vadd.f32 1e-05, %v799_v56 }
 0x140   : > { %5722 = vrsqrt.f32 %v808_v57 }
 0x14a   : > { %v5723_v58 = vpop.eup %5722 }
 0x14b   : > { %v6133_v59 = vmul.f32 %v5723_v58, %v805_v49  ;;  %v6135_v60 = vmul.f32 %v5723_v58, %v800_v50  ;;  %v6137_v61 = vmul.f32 %v5723_v58, %v801_v41  ;;  %v6139_v63 = vmul.f32 %v5723_v58, %v802_v46 }
 0x14c   : > { %v6141_v1 = vmul.f32 %v5723_v58, %v803_v51  ;;  %v6143_v2 = vmul.f32 %v5723_v58, %v804_v52  ;;  %v6145_v3 = vmul.f32 %v5723_v58, %v806_v54  ;;  %v6147_v4 = vmul.f32 %v5723_v58, %v807_v55 }
 0x14d   : > { %v823_v6 = vsub.f32 %v6107_v8, %v6133_v59  ;;  %v818_v10 = vsub.f32 %v6071_v45, %v6135_v60  ;;  %v819_v11 = vsub.f32 %v6077_v48, %v6137_v61  ;;  %v820_v12 = vsub.f32 %v6069_v44, %v6139_v63  ;;  %v6177_v44 = vpop.permute.xlu0 %849  ;;  %v6179_v45 = vpop.permute.xlu1 %859 }
 0x14e   : > { %v821_v13 = vsub.f32 %v6075_v47, %v6141_v1  ;;  %v822_v14 = vsub.f32 %v6098_v0, %v6143_v2  ;;  %v824_v8 = vsub.f32 %v6096_v62, %v6145_v3  ;;  %v825_v15 = vsub.f32 %v6105_v5, %v6147_v4  ;;  %v6181_v47 = vld [vmem:[#allocation2 + $0x8] sm:$0xff] }
 0x14f   : > { %831 = vst.msk [vmem:[#allocation2 + $0x38] sm:$0xff] %vm575_vm0, %v823_v6  ;;  %826 = vst.msk [vmem:[#allocation2 + $0x10] sm:$0xff] %vm575_vm0, %v818_v10  ;;  %v5673_v5 = vld [vmem:[%s7358_s1 + $0x8] sm:$0xff]  }
 0x150   : > { %827 = vst.msk [vmem:[#allocation2 + $0x18] sm:$0xff] %vm575_vm0, %v819_v11  ;;  %828 = vst.msk [vmem:[#allocation2 + $0x20] sm:$0xff] %vm575_vm0, %v820_v12 }
 0x151   : > { %829 = vst.msk [vmem:[#allocation2 + $0x28] sm:$0xff] %vm575_vm0, %v821_v13  ;;  %830 = vst.msk [vmem:[#allocation2 + $0x30] sm:$0xff] %vm575_vm0, %v822_v14  ;;  %v6209_v25 = vpop.permute.xlu0 %864  ;;  %v6211_v26 = vpop.permute.xlu1 %869 }
 0x152   : > { %832 = vst.msk [vmem:[#allocation2 + $0x40] sm:$0xff] %vm575_vm0, %v824_v8  ;;  %833 = vst.msk [vmem:[#allocation2 + $0x48] sm:$0xff] %vm575_vm0, %v825_v15 }
 0x155   : > { %v6252_v51 = vpop.permute.xlu0 %874  ;;  %v6254_v52 = vpop.permute.xlu1 %879 }
 0x156   : > { %v6183_v48 = vld [vmem:[#allocation2 + $0x10] sm:$0xff]  ;;  %v904_v38 = vld [vmem:[#allocation2 + $0x38] sm:$0xff] }
 0x157   : > { %v6185_v62 = vld [vmem:[#allocation2 + $0x18] sm:$0xff]  ;;  %v6187_v0 = vld [vmem:[#allocation2 + $0x20] sm:$0xff]  ;;  %v911_v16 = vpack.c.bf16 %v6183_v48, %v6181_v47  ;;  %v1255_v20 = vld [vmem:[#allocation2 + $0xf] sm:$0xff] }
 0x158   : > { %v6196_v17 = vpack.c.bf16 %v6187_v0, %v6185_v62  ;;  %v6198_v18 = vld [vmem:[#allocation2 + $0x28] sm:$0xff]  ;;  %v6200_v19 = vld [vmem:[#allocation2 + $0x30] sm:$0xff]  ;;  %v1263_v22 = vmul.f32 %v1255_v20, %v6151_v7  ;;  %v6205_v23 = vld [vmem:[#allocation2 + $0x1f] sm:$0xff]  ;;  %v883_v49 = vmul.f32 %v1255_v20, %v6177_v44  ;;  %v1390_v11 = vpack.c.bf16 %v6185_v62, %v6183_v48 }
 0x159   : > { %v6202_v21 = vld [vmem:[#allocation2 + $0x17] sm:$0xff]  ;;  %v6207_v24 = vld [vmem:[#allocation2 + $0x27] sm:$0xff]  ;;  %5089 = vmatprep.mubr.msk.bf16.mxu0 %vm575_vm0, %v911_v16  ;;  %v6216_v27 = vpack.c.bf16 %v6200_v19, %v6198_v18  ;;  %v1265_v29 = vmul.f32 %v6205_v23, %v6153_v9  ;;  %v6224_v31 = vld [vmem:[#allocation2 + $0x2f] sm:$0xff]  ;;  %v885_v10 = vmul.f32 %v6205_v23, %v6179_v45  ;;  %v6287_v14 = vpop.permute.xlu0 %1103  ;;  %v6289_v8 = vpop.permute.xlu1 %1108  ;;  %v1391_v20 = vpack.c.bf16 %v6198_v18, %v6187_v0 }
 0x15a   : > { %v1264_v28 = vmul.f32 %v6202_v21, %v6177_v44  ;;  %v1266_v30 = vmul.f32 %v6207_v24, %v6179_v45  ;;  %v6226_v32 = vld [vmem:[#allocation2 + $0x37] sm:$0xff]  ;;  %5090 = vmatmul.mubr.msk.bf16.vlgmr.msra.gmra.mrb[8].mxu0 %vm575_vm0, %v6196_v17  ;;  %v1267_v33 = vmul.f32 %v6224_v31, %v6209_v25  ;;  %v6244_v46 = vld [vmem:[#allocation2 + $0x40] sm:$0xff]  ;;  %v894_v57 = vpack.c.bf16 %v883_v49, %v6259_v53  ;;  %v1093_v62 = vld [vmem:[#allocation2 + $0x9] sm:$0xff] }
 0x15b   : > { %v1268_v34 = vmul.f32 %v6226_v32, %v6211_v26  ;;  %5093 = vmatprep.mubr.msk.bf16.mxu0 %vm575_vm0, %v6216_v27  ;;  %5098 = vmatpush3.bf16.msra.mxu0 %v6066_v43  ;;  %v6247_v50 = vld [vmem:[#allocation2 + $0x3f] sm:$0xff]  ;;  %v6249_v43 = vld [vmem:[#allocation2 + $0x47] sm:$0xff]  ;;  %v6262_v54 = vpack.c.bf16 %v6244_v46, %v904_v38  ;;  %v884_v6 = vmul.f32 %v6202_v21, %v6153_v9  ;;  %v1094_v16 = vld [vmem:[#allocation2 + $0x11] sm:$0xff] }
 0x15c   : > { %v1276_v35 = vpack.c.bf16 %v1264_v28, %v1263_v22  ;;  %v1277_v36 = vpack.c.bf16 %v1266_v30, %v1265_v29  ;;  %5099 = vmatprep.subr.bf16.mxu0 %v5673_v5  ;;  %v1269_v55 = vmul.f32 %v6247_v50, %v6252_v51  ;;  %v1270_v56 = vmul.f32 %v6249_v43, %v6254_v52  ;;  %v5676_v29 = vld [vmem:[%s7358_s1 + $0x58] sm:$0xff]   ;;  %v6327_v49 = vld [vmem:[#allocation2 + $0x29] sm:$0xff] }
 0x15d   : > { %v1278_v41 = vpack.c.bf16 %v1268_v34, %v1267_v33  ;;  %v886_v12 = vmul.f32 %v6207_v24, %v6209_v25  ;;  %v887_v13 = vmul.f32 %v6224_v31, %v6211_v26  ;;  %v895_v15 = vpack.c.bf16 %v885_v10, %v884_v6  ;;  %v6310_v0 = vpop.permute.xlu1 %1118  ;;  %v6313_v18 = vld [vmem:[#allocation2 + $0x19] sm:$0xff] }
 0x15e   : > { %5125 = vmatprep.mubr.msk.bf16.mxu1 %vm575_vm0, %v1276_v35  ;;  %v1279_v58 = vpack.c.bf16 %v1270_v56, %v1269_v55  ;;  %v888_v22 = vmul.f32 %v6226_v32, %v6252_v51  ;;  %v889_v28 = vmul.f32 %v6247_v50, %v6254_v52  ;;  %v1392_v30 = vpack.c.bf16 %v904_v38, %v6200_v19  ;;  %v6308_v35 = vpop.permute.xlu0 %1113  ;;  %v5678_v19 = vld [vmem:[%s7358_s1 + $0x60] sm:$0xff]   ;;  %v6319_v38 = vld [vmem:[#allocation2 + $0x48] sm:$0xff]  ;;  %v6329_v55 = vld [vmem:[#allocation2 + $0x31] sm:$0xff] }
 0x15f   : > { %5126 = vmatmul.mubr.msk.bf16.vlgmr.msra.gmra.mrb[0].mxu1 %vm575_vm0, %v1277_v36  ;;  %5100 = vmatpush3.bf16.msra.mxu0 %v5673_v5  ;;  %v5677_v5 = vld [vmem:[%s7358_s1 + $0x28] sm:$0xff]   ;;  %v896_v48 = vpack.c.bf16 %v887_v13, %v886_v12  ;;  %v1141_v33 = vmul.f32 %v6287_v14, %v1093_v62  ;;  %v1142_v34 = vmul.f32 %v6289_v8, %v1094_v16  ;;  %v6347_v13 = vld [vmem:[#allocation2 + $0x39] sm:$0xff] }
 0x160   : > { %5134 = vmatpush3.bf16.msra.mxu1 %v6060_v42  ;;  %5129 = vmatprep.mubr.msk.bf16.mxu1 %vm575_vm0, %v1278_v41  ;;  %v5674_v42 = vld [vmem:[%s7358_s1 + $0x50] sm:$0xff]   ;;  %v897_v36 = vpack.c.bf16 %v889_v28, %v888_v22  ;;  %v6324_v41 = vld [vmem:[#allocation2 + $0x21] sm:$0xff] }
 0x161   : > { %5135 = vmatprep.subr.bf16.mxu1 %v5672_v39  ;;  %5109 = vmatprep.subr.bf16.mxu0 %v5675_v40  ;;  %v1154_v37 = vpack.c.bf16 %v1142_v34, %v1141_v33  ;;  %v1144_v6 = vmul.f32 %v6310_v0, %v6324_v41  ;;  %v5679_v34 = vld [vmem:[%s7358_s1 + $0x68] sm:$0xff]  }
 0x162   : > { %5094 = vmatmul.mubr.msk.bf16.gmra.mrb[12].mxu0 %vm575_vm0, %v6262_v54  ;;  %v6332_v56 = vpop.permute.xlu0 %1123 }
 0x163   : > { %5101 = vmatprep.mubr.msk.bf16.mxu0 %vm575_vm0, %v894_v57  ;;  %v1393_v57 = vpack.c.bf16 %v6319_v38, %v6244_v46  ;;  %v1503_v62 = vmul.f32 %v6332_v56, %v6329_v55 }
 0x164   : > { %5136 = vmatpush3.bf16.msra.mxu1 %v5672_v39  ;;  %v1499_v39 = vmul.f32 %v6287_v14, %v1094_v16 }
 0x165   : > { %5145 = vmatprep.subr.bf16.mxu1 %v5674_v42 }
 0x166   : > { %v6361_v22 = vpop.permute.xlu0 %1133 }
 0x167   : > { %5130 = vmatmul.mubr.msk.bf16.gmra.mrb[4].mxu1 %vm575_vm0, %v1279_v58  ;;  %v1143_v58 = vmul.f32 %v6313_v18, %v6308_v35 }
 0x168   : > { %5137 = vmatprep.mubr.msk.bf16.mxu1 %vm575_vm0, %v1390_v11  ;;  %v1145_v11 = vmul.f32 %v6332_v56, %v6327_v49 }
 0x169   : > { %v1155_v46 = vpack.c.bf16 %v1144_v6, %v1143_v58  ;;  %v5680_v58 = vld [vmem:[%s7358_s1 + $0x70] sm:$0xff]   ;;  %v1621_v6 = vmul.f32 %v6202_v21, %v6151_v7  ;;  %v1625_v21 = vmul.f32 %v6226_v32, %v6209_v25  ;;  %v5682_v32 = vld [vmem:[%s7358_s1 + $0x80] sm:$0xff]  }
 0x16a   : > { %5102 = vmatmul.mubr.msk.bf16.vlgmr.msra.gmra.mrb[8].mxu0 %vm575_vm0, %v895_v15  ;;  %v1501_v15 = vmul.f32 %v6308_v35, %v6324_v41 }
 0x16b   : > { %5105 = vmatprep.mubr.msk.bf16.mxu0 %vm575_vm0, %v896_v48  ;;  %5110 = vmatpush3.bf16.msra.mxu0 %v5675_v40  ;;  %v1500_v40 = vmul.f32 %v6313_v18, %v6289_v8 }
 0x16c   : > { %5111 = vmatprep.subr.bf16.mxu0 %v5677_v5 }
 0x16d   : > { %v1512_v10 = vpack.c.bf16 %v1500_v40, %v1499_v39 }
 0x16f   : > { %5138 = vmatmul.mubr.msk.bf16.vlgmr.msra.gmra.mrb[0].mxu1 %vm575_vm0, %v1391_v20  ;;  %5112 = vmatpush3.bf16.msra.mxu0 %v5677_v5  ;;  %v1502_v5 = vmul.f32 %v6310_v0, %v6327_v49  ;;  %v6358_v20 = vld [vmem:[#allocation2 + $0x41] sm:$0xff] }
 0x170   : > { %5146 = vmatpush3.bf16.msra.mxu1 %v5674_v42  ;;  %5141 = vmatprep.mubr.msk.bf16.mxu1 %vm575_vm0, %v1392_v30  ;;  %v6334_v42 = vpop.permute.xlu1 %1128  ;;  %v1147_v30 = vmul.f32 %v6347_v13, %v6361_v22  ;;  %v1505_v40 = vmul.f32 %v6361_v22, %v6358_v20 }
 0x171   : > { %5147 = vmatprep.subr.bf16.mxu1 %v5676_v29  ;;  %v1146_v12 = vmul.f32 %v6334_v42, %v6329_v55  ;;  %v1504_v16 = vmul.f32 %v6347_v13, %v6334_v42 }
 0x172   : > { %5106 = vmatmul.mubr.msk.bf16.gmra.mrb[12].mxu0 %vm575_vm0, %v897_v36 }
 0x173   : > { %5113 = vmatprep.mubr.msk.bf16.mxu0 %vm575_vm0, %v1154_v37  ;;  %v1156_v48 = vpack.c.bf16 %v1146_v12, %v1145_v11  ;;  %v1514_v36 = vpack.c.bf16 %v1504_v16, %v1503_v62  ;;  %v1498_v37 = vld [vmem:[#allocation2 + $0x49] sm:$0xff]  ;;  %v1623_v12 = vmul.f32 %v6207_v24, %v6153_v9  ;;  %v1627_v24 = vmul.f32 %v6249_v43, %v6252_v51 }
 0x174   : > { %5148 = vmatpush3.bf16.msra.mxu1 %v5676_v29  ;;  %v6363_v28 = vpop.permute.xlu1 %1138  ;;  %v1513_v29 = vpack.c.bf16 %v1502_v5, %v1501_v15  ;;  %v5681_v5 = vld [vmem:[%s7358_s1 + $0x78] sm:$0xff]   ;;  %v1620_v62 = vld [vmem:[#allocation2 + $0x4f] sm:$0xff] }
 0x175   : > { %5157 = vmatprep.subr.bf16.mxu1 %v5678_v19  ;;  %v1148_v33 = vmul.f32 %v6363_v28, %v6358_v20  ;;  %v5683_v16 = vld [vmem:[%s7358_s1 + $0x88] sm:$0xff]   ;;  %v6417_v43 = vld [vmem:[#allocation2 + $0x50] sm:$0xff] }
 0x177   : > { %5142 = vmatmul.mubr.msk.bf16.gmra.mrb[4].mxu1 %vm575_vm0, %v1393_v57  ;;  %v1157_v39 = vpack.c.bf16 %v1148_v33, %v1147_v30  ;;  %v1506_v57 = vmul.f32 %v1498_v37, %v6363_v28  ;;  %v1751_v30 = vpack.c.bf16 %v6417_v43, %v6319_v38  ;;  %v1856_v38 = vld [vmem:[#allocation2 + $0x51] sm:$0xff] }
 0x178   : > { %5149 = vmatprep.mubr.msk.bf16.mxu1 %vm575_vm0, %v1512_v10  ;;  %v1622_v10 = vmul.f32 %v6205_v23, %v6177_v44  ;;  %v1626_v23 = vmul.f32 %v6247_v50, %v6211_v26 }
 0x17a   : > { %5114 = vmatmul.mubr.msk.bf16.vlgmr.msra.gmra.mrb[8].mxu0 %vm575_vm0, %v1155_v46  ;;  %v1634_v11 = vpack.c.bf16 %v1622_v10, %v1621_v6  ;;  %v1624_v46 = vmul.f32 %v6224_v31, %v6179_v45  ;;  %v1628_v31 = vmul.f32 %v1620_v62, %v6254_v52 }
 0x17b   : > { %5117 = vmatprep.mubr.msk.bf16.mxu0 %vm575_vm0, %v1156_v48  ;;  %v1636_v48 = vpack.c.bf16 %v1626_v23, %v1625_v21  ;;  %v4686_v21 = vld [vmem:[%s7310_s6] ss:$0 sm:$0xff] }
 0x17c   : > { %v1635_v15 = vpack.c.bf16 %v1624_v46, %v1623_v12  ;;  %v1637_v50 = vpack.c.bf16 %v1628_v31, %v1627_v24 }
 0x17f   : > { %5150 = vmatmul.mubr.msk.bf16.vlgmr.msra.gmra.mrb[0].mxu1 %vm575_vm0, %v1513_v29  ;;  %v1857_v29 = vmul.f32 %v6313_v18, %v6287_v14  ;;  %v1861_v18 = vmul.f32 %v6347_v13, %v6332_v56  ;;  %v5684_v13 = vld [vmem:[%s7307_s3 + $0x10] sm:$0xff]  }
 0x180   : > { %5158 = vmatpush3.bf16.msra.mxu1 %v5678_v19  ;;  %5153 = vmatprep.mubr.msk.bf16.mxu1 %vm575_vm0, %v1514_v36  ;;  %v1515_v19 = vpack.c.bf16 %v1506_v57, %v1505_v40 }
 0x181   : > { %5159 = vmatprep.subr.bf16.mxu1 %v5679_v34  ;;  %5193 = vmatprep.subr.bf16.mxu0 %v5684_v13 }
 0x182   : > { %5118 = vmatmul.mubr.msk.bf16.gmra.mrb[12].mxu0 %vm575_vm0, %v1157_v39  ;;  %v1863_v39 = vmul.f32 %v1498_v37, %v6361_v22  ;;  %v6452_v37 = vld [vmem:[%s7307_s3] sm:$0xff]  }
 0x183   : > { %5194 = vmatpush3.bf16.msra.mxu0 %v5684_v13 }
 0x184   : > { %5160 = vmatpush3.bf16.msra.mxu1 %v5679_v34 }
 0x185   : > { %5169 = vmatprep.subr.bf16.mxu1 %v5680_v58 }
 0x187   : > { %5154 = vmatmul.mubr.msk.bf16.gmra.mrb[4].mxu1 %vm575_vm0, %v1515_v19 }
 0x188   : > { %5161 = vmatprep.mubr.msk.bf16.mxu1 %vm575_vm0, %v1634_v11 }
 0x18f   : > { %5162 = vmatmul.mubr.msk.bf16.vlgmr.msra.gmra.mrb[0].mxu1 %vm575_vm0, %v1635_v15 }
 0x190   : > { %5170 = vmatpush3.bf16.msra.mxu1 %v5680_v58  ;;  %5165 = vmatprep.mubr.msk.bf16.mxu1 %vm575_vm0, %v1636_v48 }
 0x191   : > { %5171 = vmatprep.subr.bf16.mxu1 %v5681_v5 }
 0x194   : > { %5172 = vmatpush3.bf16.msra.mxu1 %v5681_v5  ;;  %v4687_v5 = vld [vmem:[%s7311_s7] ss:$0 sm:$0xff] }
 0x195   : > { %5181 = vmatprep.subr.bf16.mxu1 %v5682_v32 }
 0x197   : > { %5166 = vmatmul.mubr.msk.bf16.gmra.mrb[4].mxu1 %vm575_vm0, %v1637_v50 }
 0x198   : > { %5173 = vmatprep.mubr.msk.bf16.mxu1 %vm575_vm0, %v6196_v17  ;;  %v1858_v17 = vmul.f32 %v6289_v8, %v6324_v41  ;;  %v1862_v41 = vmul.f32 %v6334_v42, %v6358_v20  ;;  %v5685_v20 = vld [vmem:[%s7307_s3 + $0x18] sm:$0xff]  }
 0x199   : > { %5195 = vmatprep.subr.bf16.mxu0 %v5685_v20 }
 0x19a   : > { %v1870_v33 = vpack.c.bf16 %v1858_v17, %v1857_v29  ;;  %v1872_v36 = vpack.c.bf16 %v1862_v41, %v1861_v18  ;;  %5196 = vmatpush3.bf16.msra.mxu0 %v5685_v20  ;;  %v4688_v18 = vld [vmem:[%s7312_s8] ss:$0 sm:$0xff] }
 0x19b   : > { %5205 = vmatprep.subr.bf16.mxu0 %v6452_v37  ;;  %v4689_v20 = vld [vmem:[%s7313_s9] ss:$0 sm:$0xff] }
 0x19f   : > { %5174 = vmatmul.mubr.msk.bf16.vlgmr.msra.gmra.mrb[0].mxu1 %vm575_vm0, %v6216_v27  ;;  %v1859_v27 = vmul.f32 %v6308_v35, %v6327_v49  ;;  %v6439_v49 = vmul.f32 %v1856_v38, %v6363_v28 }
 0x1a0   : > { %5182 = vmatpush3.bf16.msra.mxu1 %v5682_v32  ;;  %5177 = vmatprep.mubr.msk.bf16.mxu1 %vm575_vm0, %v6262_v54  ;;  %v1860_v54 = vmul.f32 %v6310_v0, %v6329_v55 }
 0x1a1   : > { %5183 = vmatprep.subr.bf16.mxu1 %v5683_v16  ;;  %v1873_v55 = vpack.c.bf16 %v6439_v49, %v1863_v39 }
 0x1a2   : > { %v1871_v34 = vpack.c.bf16 %v1860_v54, %v1859_v27 }
 0x1a4   : > { %5184 = vmatpush3.bf16.msra.mxu1 %v5683_v16 }
 0x1a7   : > { %5178 = vmatmul.mubr.msk.bf16.gmra.mrb[4].mxu1 %vm575_vm0, %v1751_v30 }
 0x1a8   : > { %5185 = vmatprep.mubr.msk.bf16.mxu1 %vm575_vm0, %v1870_v33 }
 0x1af   : > { %5186 = vmatmul.mubr.msk.bf16.vlgmr.msra.gmra.mrb[0].mxu1 %vm575_vm0, %v1871_v34 }
 0x1b0   : > { %5189 = vmatprep.mubr.msk.bf16.mxu1 %vm575_vm0, %v1872_v36 }
 0x1b7   : > { %5190 = vmatmul.mubr.msk.bf16.gmra.mrb[4].mxu1 %vm575_vm0, %v1873_v55 }
 0x24d   : > { %v5115_v40 = vpop.f32.mrb[8].mxu0 }
 0x24e   : > { %v1216_v57 = vpop.f32.mrb[9].mxu0 }
 0x24f   : > { %v5116_v58 = vpop.f32.mrb[10].mxu0 }
 0x250   : > { %v1219_v6 = vpop.f32.mrb[11].mxu0 }
 0x255   : > { %v5119_v10 = vpop.f32.mrb[12].mxu0 }
 0x256   : > { %v1232_v19 = vpop.f32.mrb[13].mxu0 }
 0x257   : > { %v5120_v11 = vpop.f32.mrb[14].mxu0 }
 0x258   : > { %v1235_v12 = vpop.f32.mrb[15].mxu0 }
 0x282   : > { %v5187_v46 = vpop.f32.mrb[0].mxu1 }
 0x283   : > { %v5421_v23 = vadd.f32 %v5187_v46, %v5115_v40  ;;  %v1932_v15 = vpop.f32.mrb[1].mxu1 }
 0x284   : > { %v5422_v48 = vadd.f32 %v1932_v15, %v1216_v57  ;;  %v5188_v62 = vpop.f32.mrb[2].mxu1 }
 0x285   : > { %v1980_v24 = vmul.f32 %v5421_v23, %v4686_v21  ;;  %v5423_v31 = vadd.f32 %v5188_v62, %v5116_v58  ;;  %v1935_v32 = vpop.f32.mrb[3].mxu1 }
 0x286   : > { %v1978_v50 = vmul.f32 %v5422_v48, %v4686_v21  ;;  %v5424_v16 = vadd.f32 %v1935_v32, %v1219_v6 }
 0x287   : > { %v6461_v29 = vadd.f32 %v4687_v5, %v1980_v24  ;;  %v1981_v17 = vmul.f32 %v5423_v31, %v4686_v21 }
 0x288   : > { %v6463_v30 = vadd.f32 %v4687_v5, %v1978_v50  ;;  %v1979_v33 = vmul.f32 %v5424_v16, %v4686_v21 }
 0x289   : > { %v2003_v27 = vmax.f32 %v6461_v29, 0.0  ;;  %v6466_v54 = vadd.f32 %v4687_v5, %v1981_v17  ;;  %v3241_v29 = vld [vmem:[#allocation2 + $0x8] sm:$0xff] }
 0x28a   : > { %v2001_v41 = vmax.f32 %v6463_v30, 0.0  ;;  %v6472_v34 = vadd.f32 %v4687_v5, %v1979_v33  ;;  %v5191_v36 = vpop.f32.mrb[4].mxu1 }
 0x28b   : > { %v2011_v38 = vadd.f32 %v2003_v27, %v6139_v63  ;;  %v7335_v39 = vmax.f32 %v6466_v54, 0.0  ;;  %v5425_v55 = vadd.f32 %v5191_v36, %v5119_v10  ;;  %v1948_v13 = vpop.f32.mrb[5].mxu1 }
 0x28c   : > { %v2009_v40 = vadd.f32 %v2001_v41, %v6135_v60  ;;  %v2002_v57 = vmax.f32 %v6472_v34, 0.0  ;;  %v5426_v58 = vadd.f32 %v1948_v13, %v1232_v19  ;;  %v5192_v6 = vpop.f32.mrb[6].mxu1 }
 0x28d   : > { %v2026_v46 = vmul.f32 %v4688_v18, %v2011_v38  ;;  %v2012_v63 = vadd.f32 %v7335_v39, %v6141_v1  ;;  %v1984_v23 = vmul.f32 %v5425_v55, %v4686_v21  ;;  %v5427_v10 = vadd.f32 %v5192_v6, %v5120_v11  ;;  %v1951_v15 = vpop.f32.mrb[7].mxu1 }
 0x28e   : > { %v2024_v48 = vmul.f32 %v4688_v18, %v2009_v40  ;;  %v2010_v62 = vadd.f32 %v2002_v57, %v6137_v61  ;;  %v1982_v24 = vmul.f32 %v5426_v58, %v4686_v21  ;;  %v5428_v31 = vadd.f32 %v1951_v15, %v1235_v12 }
 0x28f   : > { %v2041_v60 = vadd.f32 %v4689_v20, %v2026_v46  ;;  %v2027_v32 = vmul.f32 %v4688_v18, %v2012_v63  ;;  %v6491_v50 = vadd.f32 %v4687_v5, %v1984_v23  ;;  %v1985_v19 = vmul.f32 %v5427_v10, %v4686_v21 }
 0x290   : > { %v2039_v16 = vadd.f32 %v4689_v20, %v2024_v48  ;;  %v2025_v17 = vmul.f32 %v4688_v18, %v2010_v62  ;;  %v6493_v33 = vadd.f32 %v4687_v5, %v1982_v24  ;;  %v1983_v1 = vmul.f32 %v5428_v31, %v4686_v21 }
 0x291   : > { %v2049_v36 = vmax.f32 %v2041_v60, 0.0  ;;  %v2042_v11 = vadd.f32 %v4689_v20, %v2027_v32  ;;  %v7332_v38 = vmax.f32 %v6491_v50, 0.0  ;;  %v6496_v55 = vadd.f32 %v4687_v5, %v1985_v19 }
 0x292   : > { %v2047_v13 = vmax.f32 %v2039_v16, 0.0  ;;  %v2040_v61 = vadd.f32 %v4689_v20, %v2025_v17  ;;  %v7334_v12 = vmax.f32 %v6493_v33, 0.0  ;;  %v6499_v40 = vadd.f32 %v4687_v5, %v1983_v1 }
 0x293   : > { %2057 = vst.msk [vmem:[#allocation2 + $0x20] sm:$0xff] %vm575_vm0, %v2049_v36  ;;  %v2050_v58 = vmax.f32 %v2042_v11, 0.0  ;;  %v2015_v6 = vadd.f32 %v7332_v38, %v6145_v3  ;;  %v7331_v21 = vmax.f32 %v6496_v55, 0.0  ;;  %v5687_v36 = vld [vmem:[%s7307_s3 + $0x8] sm:$0xff]   ;;  %v5688_v11 = vld [vmem:[%s7307_s3 + $0x20] sm:$0xff]   ;;  %v7371_v30 = vmax.f32 %v6496_v55, 0.0 }
 0x294   : > { %2055 = vst.msk [vmem:[#allocation2 + $0x10] sm:$0xff] %vm575_vm0, %v2047_v13  ;;  %v2048_v46 = vmax.f32 %v2040_v61, 0.0  ;;  %v2013_v63 = vadd.f32 %v7334_v12, %v6143_v2  ;;  %v7333_v23 = vmax.f32 %v6499_v40, 0.0 }
 0x295   : > { %2058 = vst.msk [vmem:[#allocation2 + $0x28] sm:$0xff] %vm575_vm0, %v2050_v58  ;;  %v2030_v5 = vmul.f32 %v4688_v18, %v2015_v6  ;;  %v2016_v10 = vadd.f32 %v7331_v21, %v6147_v4 }
 0x296   : > { %2056 = vst.msk [vmem:[#allocation2 + $0x18] sm:$0xff] %vm575_vm0, %v2048_v46  ;;  %v2028_v3 = vmul.f32 %v4688_v18, %v2013_v63  ;;  %v2014_v15 = vadd.f32 %v7333_v23, %v6133_v59 }
 0x297   : > { %v2045_v48 = vadd.f32 %v4689_v20, %v2030_v5  ;;  %v2031_v62 = vmul.f32 %v4688_v18, %v2016_v10 }
 0x298   : > { %v2043_v24 = vadd.f32 %v4689_v20, %v2028_v3  ;;  %v2029_v2 = vmul.f32 %v4688_v18, %v2014_v15 }
 0x299   : > { %v2053_v31 = vmax.f32 %v2045_v48, 0.0  ;;  %v2046_v60 = vadd.f32 %v4689_v20, %v2031_v62 }
 0x29a   : > { %v2051_v32 = vmax.f32 %v2043_v24, 0.0  ;;  %v2044_v19 = vadd.f32 %v4689_v20, %v2029_v2  ;;  %v6528_v18 = vld [vmem:[#allocation2 + $0x20] sm:$0xff] }
 0x29b   : > { %2061 = vst.msk [vmem:[#allocation2 + $0x40] sm:$0xff] %vm575_vm0, %v2053_v31  ;;  %v2054_v16 = vmax.f32 %v2046_v60, 0.0  ;;  %v6520_v17 = vld [vmem:[#allocation2 + $0x10] sm:$0xff]  ;;  %v5689_v60 = vld [vmem:[%s7307_s3 + $0x28] sm:$0xff]  }
 0x29c   : > { %2059 = vst.msk [vmem:[#allocation2 + $0x30] sm:$0xff] %vm575_vm0, %v2051_v32  ;;  %v2052_v4 = vmax.f32 %v2044_v19, 0.0  ;;  %v2100_v1 = vpack.c.bf16 %v6520_v17, %v6181_v47  ;;  %v6541_v47 = vld [vmem:[#allocation2 + $0xf] sm:$0xff]  ;;  %v6581_v24 = vld [vmem:[#allocation2 + $0x27] sm:$0xff] }
 0x29d   : > { %2062 = vst.msk [vmem:[#allocation2 + $0x48] sm:$0xff] %vm575_vm0, %v2054_v16  ;;  %v6526_v59 = vld [vmem:[#allocation2 + $0x18] sm:$0xff]  ;;  %v6547_v13 = vld [vmem:[#allocation2 + $0x28] sm:$0xff]  ;;  %v2072_v58 = vmul.f32 %v6541_v47, %v6177_v44  ;;  %v2075_v2 = vmul.f32 %v6581_v24, %v6209_v25  ;;  %v2415_v12 = vmul.f32 %v6581_v24, %v6179_v45 }
 0x29e   : > { %2060 = vst.msk [vmem:[#allocation2 + $0x38] sm:$0xff] %vm575_vm0, %v2052_v4  ;;  %5197 = vmatprep.mubr.msk.bf16.mxu0 %vm575_vm0, %v2100_v1  ;;  %v6534_v20 = vpack.c.bf16 %v6528_v18, %v6526_v59  ;;  %v6568_v10 = vld [vmem:[#allocation2 + $0x17] sm:$0xff]  ;;  %v6570_v3 = vld [vmem:[#allocation2 + $0x1f] sm:$0xff] }
 0x29f   : > { %v2083_v5 = vpack.c.bf16 %v2072_v58, %v6259_v53  ;;  %v2073_v48 = vmul.f32 %v6568_v10, %v6153_v9  ;;  %v2074_v62 = vmul.f32 %v6570_v3, %v6179_v45  ;;  %v6595_v4 = vld [vmem:[#allocation2 + $0x11] sm:$0xff]  ;;  %v2282_v58 = vld [vmem:[#allocation2 + $0x9] sm:$0xff] }
 0x2a0   : > { %5198 = vmatmul.mubr.msk.bf16.vlgmr.msra.gmra.mrb[16].mxu0 %vm575_vm0, %v6534_v20 }
 0x2a1   : > { %5206 = vmatpush3.bf16.msra.mxu0 %v6452_v37  ;;  %v2084_v31 = vpack.c.bf16 %v2074_v62, %v2073_v48  ;;  %v2291_v48 = vmul.f32 %v6595_v4, %v6289_v8 }
 0x2a2   : > { %5207 = vmatprep.subr.bf16.mxu0 %v5687_v36  ;;  %v6559_v63 = vld [vmem:[#allocation2 + $0x40] sm:$0xff] }
 0x2a3   : > { %v6549_v61 = vld [vmem:[#allocation2 + $0x30] sm:$0xff] }
 0x2a4   : > { %v6555_v6 = vpack.c.bf16 %v6549_v61, %v6547_v13  ;;  %v6574_v15 = vld [vmem:[#allocation2 + $0x2f] sm:$0xff]  ;;  %v6631_v38 = vld [vmem:[#allocation2 + $0x41] sm:$0xff] }
 0x2a5   : > { %v6557_v46 = vld [vmem:[#allocation2 + $0x38] sm:$0xff]  ;;  %5208 = vmatpush3.bf16.msra.mxu0 %v5687_v36  ;;  %v2076_v53 = vmul.f32 %v6574_v15, %v6211_v26 }
 0x2a6   : > { %5201 = vmatprep.mubr.msk.bf16.mxu0 %vm575_vm0, %v6555_v6  ;;  %v6565_v37 = vpack.c.bf16 %v6559_v63, %v6557_v46  ;;  %5217 = vmatprep.subr.bf16.mxu0 %v5688_v11  ;;  %v6590_v19 = vld [vmem:[#allocation2 + $0x37] sm:$0xff]  ;;  %v6592_v16 = vld [vmem:[#allocation2 + $0x3f] sm:$0xff] }
 0x2a7   : > { %v2085_v32 = vpack.c.bf16 %v2076_v53, %v2075_v2  ;;  %v2077_v1 = vmul.f32 %v6590_v19, %v6252_v51  ;;  %v2078_v36 = vmul.f32 %v6592_v16, %v6254_v52  ;;  %v6608_v2 = vld [vmem:[#allocation2 + $0x19] sm:$0xff]  ;;  %v2417_v39 = vmul.f32 %v6590_v19, %v6211_v26 }
 0x2a8   : > { %5202 = vmatmul.mubr.msk.bf16.gmra.mrb[20].mxu0 %vm575_vm0, %v6565_v37  ;;  %v2292_v21 = vmul.f32 %v6608_v2, %v6308_v35 }
 0x2a9   : > { %5209 = vmatprep.mubr.msk.bf16.mxu0 %vm575_vm0, %v2083_v5  ;;  %v5690_v5 = vld [vmem:[%s7307_s3 + $0x30] sm:$0xff]   ;;  %v2086_v62 = vpack.c.bf16 %v2078_v36, %v2077_v1 }
 0x2b0   : > { %5210 = vmatmul.mubr.msk.bf16.vlgmr.msra.gmra.mrb[16].mxu0 %vm575_vm0, %v2084_v31  ;;  %v6610_v31 = vld [vmem:[#allocation2 + $0x21] sm:$0xff] }
 0x2b1   : > { %5218 = vmatpush3.bf16.msra.mxu0 %v5688_v11  ;;  %5213 = vmatprep.mubr.msk.bf16.mxu0 %vm575_vm0, %v2085_v32  ;;  %v2290_v11 = vmul.f32 %v2282_v58, %v6287_v14  ;;  %v6613_v32 = vld [vmem:[#allocation2 + $0x31] sm:$0xff]  ;;  %v6620_v58 = vld [vmem:[#allocation2 + $0x29] sm:$0xff] }
 0x2b2   : > { %5219 = vmatprep.subr.bf16.mxu0 %v5689_v60  ;;  %v2295_v1 = vmul.f32 %v6613_v32, %v6334_v42  ;;  %v2294_v36 = vmul.f32 %v6620_v58, %v6332_v56 }
 0x2b3   : > { %v2303_v53 = vpack.c.bf16 %v2291_v48, %v2290_v11  ;;  %v5691_v11 = vld [vmem:[%s7307_s3 + $0x38] sm:$0xff]  }
 0x2b5   : > { %5220 = vmatpush3.bf16.msra.mxu0 %v5689_v60  ;;  %v2293_v60 = vmul.f32 %v6610_v31, %v6310_v0 }
 0x2b6   : > { %5229 = vmatprep.subr.bf16.mxu0 %v5690_v5 }
 0x2b7   : > { %v2304_v48 = vpack.c.bf16 %v2293_v60, %v2292_v21  ;;  %v2297_v21 = vmul.f32 %v6631_v38, %v6363_v28  ;;  %v5692_v60 = vld [vmem:[%s7307_s3 + $0x40] sm:$0xff]  }
 0x2b8   : > { %5214 = vmatmul.mubr.msk.bf16.gmra.mrb[20].mxu0 %vm575_vm0, %v2086_v62  ;;  %v2305_v62 = vpack.c.bf16 %v2295_v1, %v2294_v36  ;;  %v2413_v1 = vmul.f32 %v6568_v10, %v6177_v44 }
 0x2b9   : > { %5221 = vmatprep.mubr.msk.bf16.mxu0 %vm575_vm0, %v2303_v53  ;;  %v6629_v53 = vld [vmem:[#allocation2 + $0x39] sm:$0xff] }
 0x2ba   : > { %v2296_v23 = vmul.f32 %v6629_v53, %v6361_v22 }
 0x2bc   : > { %v2306_v36 = vpack.c.bf16 %v2297_v21, %v2296_v23  ;;  %v5693_v23 = vld [vmem:[%s7307_s3 + $0x48] sm:$0xff]  }
 0x2c0   : > { %5222 = vmatmul.mubr.msk.bf16.vlgmr.msra.gmra.mrb[16].mxu0 %vm575_vm0, %v2304_v48 }
 0x2c1   : > { %5230 = vmatpush3.bf16.msra.mxu0 %v5690_v5  ;;  %5225 = vmatprep.mubr.msk.bf16.mxu0 %vm575_vm0, %v2305_v62  ;;  %v2412_v5 = vmul.f32 %v6541_v47, %v6151_v7  ;;  %v2414_v62 = vmul.f32 %v6570_v3, %v6153_v9 }
 0x2c2   : > { %5231 = vmatprep.subr.bf16.mxu0 %v5691_v11 }
 0x2c3   : > { %v2425_v48 = vpack.c.bf16 %v2413_v1, %v2412_v5  ;;  %v2426_v47 = vpack.c.bf16 %v2415_v12, %v2414_v62  ;;  %v6659_v1 = vld [vmem:[#allocation2 + $0x47] sm:$0xff]  ;;  %v2418_v5 = vmul.f32 %v6592_v16, %v6252_v51  ;;  %v5694_v12 = vld [vmem:[%s7307_s3 + $0x50] sm:$0xff]   ;;  %v5695_v62 = vld [vmem:[%s7307_s3 + $0x58] sm:$0xff]  }
 0x2c5   : > { %5232 = vmatpush3.bf16.msra.mxu0 %v5691_v11  ;;  %v2416_v11 = vmul.f32 %v6574_v15, %v6209_v25 }
 0x2c6   : > { %5241 = vmatprep.subr.bf16.mxu0 %v5692_v60 }
 0x2c7   : > { %v2427_v21 = vpack.c.bf16 %v2417_v39, %v2416_v11  ;;  %v2541_v11 = vpack.c.bf16 %v6557_v46, %v6549_v61 }
 0x2c8   : > { %5226 = vmatmul.mubr.msk.bf16.gmra.mrb[20].mxu0 %vm575_vm0, %v2306_v36  ;;  %v2419_v36 = vmul.f32 %v6659_v1, %v6254_v52 }
 0x2c9   : > { %5233 = vmatprep.mubr.msk.bf16.mxu0 %vm575_vm0, %v2425_v48  ;;  %v2539_v48 = vpack.c.bf16 %v6526_v59, %v6520_v17  ;;  %v5696_v17 = vld [vmem:[%s7307_s3 + $0x60] sm:$0xff]   ;;  %v6686_v59 = vld [vmem:[#allocation2 + $0x48] sm:$0xff] }
 0x2ca   : > { %v2428_v39 = vpack.c.bf16 %v2419_v36, %v2418_v5  ;;  %v2542_v61 = vpack.c.bf16 %v6686_v59, %v6559_v63  ;;  %v5697_v63 = vld [vmem:[%s7307_s3 + $0x68] sm:$0xff]  }
 0x2d0   : > { %5234 = vmatmul.mubr.msk.bf16.vlgmr.msra.gmra.mrb[16].mxu0 %vm575_vm0, %v2426_v47  ;;  %v2651_v47 = vmul.f32 %v6620_v58, %v6310_v0 }
 0x2d1   : > { %5242 = vmatpush3.bf16.msra.mxu0 %v5692_v60  ;;  %5237 = vmatprep.mubr.msk.bf16.mxu0 %vm575_vm0, %v2427_v21  ;;  %v2540_v60 = vpack.c.bf16 %v6547_v13, %v6528_v18  ;;  %v2648_v18 = vmul.f32 %v6595_v4, %v6287_v14  ;;  %v2649_v13 = vmul.f32 %v6608_v2, %v6289_v8 }
 0x2d2   : > { %5243 = vmatprep.subr.bf16.mxu0 %v5693_v23  ;;  %v2653_v4 = vmul.f32 %v6629_v53, %v6334_v42  ;;  %v2650_v21 = vmul.f32 %v6610_v31, %v6308_v35 }
 0x2d3   : > { %v2661_v46 = vpack.c.bf16 %v2649_v13, %v2648_v18  ;;  %v2773_v13 = vmul.f32 %v6574_v15, %v6179_v45  ;;  %v2776_v15 = vmul.f32 %v6659_v1, %v6252_v51  ;;  %v3006_v1 = vmul.f32 %v6608_v2, %v6287_v14 }
 0x2d4   : > { %v2662_v5 = vpack.c.bf16 %v2651_v47, %v2650_v21  ;;  %v5699_v47 = vld [vmem:[%s7307_s3 + $0x78] sm:$0xff]   ;;  %v5701_v21 = vld [vmem:[%s7307_s3 + $0x88] sm:$0xff]   ;;  %v3011_v2 = vmul.f32 %v6631_v38, %v6334_v42 }
 0x2d5   : > { %5244 = vmatpush3.bf16.msra.mxu0 %v5693_v23  ;;  %v2652_v23 = vmul.f32 %v6613_v32, %v6332_v56 }
 0x2d6   : > { %5253 = vmatprep.subr.bf16.mxu0 %v5694_v12 }
 0x2d7   : > { %v2663_v36 = vpack.c.bf16 %v2653_v4, %v2652_v23  ;;  %v2769_v4 = vld [vmem:[#allocation2 + $0x4f] sm:$0xff] }
 0x2d8   : > { %5238 = vmatmul.mubr.msk.bf16.gmra.mrb[20].mxu0 %vm575_vm0, %v2428_v39  ;;  %v2654_v39 = vmul.f32 %v6631_v38, %v6361_v22  ;;  %v5703_v38 = vld [vmem:[%s7308_s4 + $0x18] sm:$0xff]  }
 0x2d9   : > { %5245 = vmatprep.mubr.msk.bf16.mxu0 %vm575_vm0, %v2539_v48 }
 0x2e0   : > { %5246 = vmatmul.mubr.msk.bf16.vlgmr.msra.gmra.mrb[16].mxu0 %vm575_vm0, %v2540_v60  ;;  %v5698_v60 = vld [vmem:[%s7307_s3 + $0x70] sm:$0xff]  }
 0x2e1   : > { %5254 = vmatpush3.bf16.msra.mxu0 %v5694_v12  ;;  %5249 = vmatprep.mubr.msk.bf16.mxu0 %vm575_vm0, %v2541_v11  ;;  %v2647_v12 = vld [vmem:[#allocation2 + $0x49] sm:$0xff]  ;;  %v2771_v11 = vmul.f32 %v6570_v3, %v6177_v44  ;;  %v2772_v3 = vmul.f32 %v6581_v24, %v6153_v9  ;;  %v5700_v24 = vld [vmem:[%s7307_s3 + $0x80] sm:$0xff]  }
 0x2e2   : > { %5255 = vmatprep.subr.bf16.mxu0 %v5695_v62  ;;  %v2655_v48 = vmul.f32 %v2647_v12, %v6363_v28 }
 0x2e5   : > { %5256 = vmatpush3.bf16.msra.mxu0 %v5695_v62  ;;  %v2770_v62 = vmul.f32 %v6568_v10, %v6151_v7  ;;  %v2775_v10 = vmul.f32 %v6592_v16, %v6211_v26 }
 0x2e6   : > { %5265 = vmatprep.subr.bf16.mxu0 %v5696_v17 }
 0x2e7   : > { %v2783_v18 = vpack.c.bf16 %v2771_v11, %v2770_v62 }
 0x2e8   : > { %5250 = vmatmul.mubr.msk.bf16.gmra.mrb[20].mxu0 %vm575_vm0, %v2542_v61  ;;  %v2774_v61 = vmul.f32 %v6590_v19, %v6209_v25  ;;  %v2777_v19 = vmul.f32 %v2769_v4, %v6254_v52 }
 0x2e9   : > { %5257 = vmatprep.mubr.msk.bf16.mxu0 %vm575_vm0, %v2661_v46  ;;  %v2784_v46 = vpack.c.bf16 %v2773_v13, %v2772_v3 }
 0x2ea   : > { %v2785_v23 = vpack.c.bf16 %v2775_v10, %v2774_v61  ;;  %v2786_v16 = vpack.c.bf16 %v2777_v19, %v2776_v15 }
 0x2f0   : > { %5258 = vmatmul.mubr.msk.bf16.vlgmr.msra.gmra.mrb[16].mxu0 %vm575_vm0, %v2662_v5  ;;  %v3007_v5 = vmul.f32 %v6610_v31, %v6289_v8  ;;  %v3008_v31 = vmul.f32 %v6620_v58, %v6308_v35  ;;  %v6780_v58 = vld [vmem:[%s7308_s4] sm:$0xff]  }
 0x2f1   : > { %5266 = vmatpush3.bf16.msra.mxu0 %v5696_v17  ;;  %5261 = vmatprep.mubr.msk.bf16.mxu0 %vm575_vm0, %v2663_v36  ;;  %v2664_v17 = vpack.c.bf16 %v2655_v48, %v2654_v39 }
 0x2f2   : > { %5267 = vmatprep.subr.bf16.mxu0 %v5697_v63 }
 0x2f5   : > { %5268 = vmatpush3.bf16.msra.mxu0 %v5697_v63  ;;  %v3019_v63 = vpack.c.bf16 %v3007_v5, %v3006_v1 }
 0x2f6   : > { %5277 = vmatprep.subr.bf16.mxu0 %v5698_v60 }
 0x2f8   : > { %5262 = vmatmul.mubr.msk.bf16.gmra.mrb[20].mxu0 %vm575_vm0, %v2664_v17 }
 0x2f9   : > { %5269 = vmatprep.mubr.msk.bf16.mxu0 %vm575_vm0, %v2783_v18 }
 0x300   : > { %5270 = vmatmul.mubr.msk.bf16.vlgmr.msra.gmra.mrb[16].mxu0 %vm575_vm0, %v2784_v46 }
 0x301   : > { %5278 = vmatpush3.bf16.msra.mxu0 %v5698_v60  ;;  %5273 = vmatprep.mubr.msk.bf16.mxu0 %vm575_vm0, %v2785_v23 }
 0x302   : > { %5279 = vmatprep.subr.bf16.mxu0 %v5699_v47 }
 0x305   : > { %5280 = vmatpush3.bf16.msra.mxu0 %v5699_v47 }
 0x306   : > { %5289 = vmatprep.subr.bf16.mxu0 %v5700_v24 }
 0x308   : > { %5274 = vmatmul.mubr.msk.bf16.gmra.mrb[20].mxu0 %vm575_vm0, %v2786_v16 }
 0x309   : > { %5281 = vmatprep.mubr.msk.bf16.mxu0 %vm575_vm0, %v6534_v20  ;;  %v2900_v20 = vpack.c.bf16 %v6417_v43, %v6686_v59  ;;  %v3012_v43 = vmul.f32 %v2647_v12, %v6361_v22 }
 0x30b   : > { %v3022_v59 = vpack.c.bf16 %v6439_v49, %v3012_v43 }
 0x310   : > { %5282 = vmatmul.mubr.msk.bf16.vlgmr.msra.gmra.mrb[16].mxu0 %vm575_vm0, %v6555_v6  ;;  %v3009_v6 = vmul.f32 %v6613_v32, %v6310_v0  ;;  %v5702_v32 = vld [vmem:[%s7308_s4 + $0x10] sm:$0xff]  }
 0x311   : > { %5290 = vmatpush3.bf16.msra.mxu0 %v5700_v24  ;;  %5285 = vmatprep.mubr.msk.bf16.mxu0 %vm575_vm0, %v6565_v37  ;;  %v3010_v37 = vmul.f32 %v6629_v53, %v6332_v56 }
 0x312   : > { %5291 = vmatprep.subr.bf16.mxu0 %v5701_v21  ;;  %v3020_v36 = vpack.c.bf16 %v3009_v6, %v3008_v31  ;;  %5301 = vmatprep.subr.bf16.mxu1 %v5702_v32 }
 0x313   : > { %v3021_v39 = vpack.c.bf16 %v3011_v2, %v3010_v37  ;;  %5302 = vmatpush3.bf16.msra.mxu1 %v5702_v32 }
 0x314   : > { %5303 = vmatprep.subr.bf16.mxu1 %v5703_v38 }
 0x315   : > { %5292 = vmatpush3.bf16.msra.mxu0 %v5701_v21 }
 0x317   : > { %5304 = vmatpush3.bf16.msra.mxu1 %v5703_v38 }
 0x318   : > { %5286 = vmatmul.mubr.msk.bf16.gmra.mrb[20].mxu0 %vm575_vm0, %v2900_v20  ;;  %5313 = vmatprep.subr.bf16.mxu1 %v6780_v58 }
 0x319   : > { %5293 = vmatprep.mubr.msk.bf16.mxu0 %vm575_vm0, %v3019_v63 }
 0x320   : > { %5294 = vmatmul.mubr.msk.bf16.vlgmr.msra.gmra.mrb[16].mxu0 %vm575_vm0, %v3020_v36 }
 0x321   : > { %5297 = vmatprep.mubr.msk.bf16.mxu0 %vm575_vm0, %v3021_v39 }
 0x328   : > { %5298 = vmatmul.mubr.msk.bf16.gmra.mrb[20].mxu0 %vm575_vm0, %v3022_v59 }
 0x3f3   : > { %v6783_v49 = vpop.f32.mrb[16].mxu0 }
 0x3f4   : > { %v6785_v53 = vpop.f32.mrb[17].mxu0  ;;  %v3144_v62 = vmul.f32 %v6783_v49, %v6783_v49  ;;  %v3123_v61 = vsel %vm575_vm0, %v6783_v49, 0.0 }
 0x3f5   : > { %v3142_v12 = vmul.f32 %v6785_v53, %v6785_v53  ;;  %v6789_v48 = vpop.f32.mrb[18].mxu0  ;;  %v3120_v11 = vsel %vm575_vm0, %v6785_v53, 0.0 }
 0x3f6   : > { %v6791_v60 = vpop.f32.mrb[19].mxu0  ;;  %v3145_v3 = vmul.f32 %v6789_v48, %v6789_v48  ;;  %v3153_v4 = vsel %vm575_vm0, %v3144_v62, 0.0  ;;  %v3125_v15 = vsel %vm575_vm0, %v6789_v48, 0.0 }
 0x3f7   : > { %v3121_v17 = vsel %vm575_vm0, %v6791_v60, 0.0  ;;  %v3143_v18 = vmul.f32 %v6791_v60, %v6791_v60  ;;  %v3150_v10 = vsel %vm575_vm0, %v3142_v12, 0.0 }
 0x3f8   : > { %v3122_v13 = vadd.f32 %v3121_v17, %v3120_v11  ;;  %v3155_v1 = vsel %vm575_vm0, %v3145_v3, 0.0 }
 0x3f9   : > { %v3151_v46 = vsel %vm575_vm0, %v3143_v18, 0.0 }
 0x3fa   : > { %v3124_v47 = vadd.f32 %v3123_v61, %v3122_v13  ;;  %v3152_v23 = vadd.f32 %v3151_v46, %v3150_v10 }
 0x3fb   : > { %v6810_v19 = vpop.f32.mrb[20].mxu0 }
 0x3fc   : > { %v3154_v24 = vadd.f32 %v3153_v4, %v3152_v23  ;;  %v6812_v16 = vpop.f32.mrb[21].mxu0  ;;  %v3126_v21 = vadd.f32 %v3125_v15, %v3124_v47  ;;  %v3148_v31 = vmul.f32 %v6810_v19, %v6810_v19  ;;  %v3131_v38 = vsel %vm575_vm0, %v6810_v19, 0.0 }
 0x3fd   : > { %v3127_v5 = vsel %vm575_vm0, %v6812_v16, 0.0  ;;  %v3146_v20 = vmul.f32 %v6812_v16, %v6812_v16  ;;  %v6819_v63 = vpop.f32.mrb[22].mxu0 }
 0x3fe   : > { %v3128_v6 = vadd.f32 %v3127_v5, %v3126_v21  ;;  %v3156_v37 = vadd.f32 %v3155_v1, %v3154_v24  ;;  %v6821_v2 = vpop.f32.mrb[23].mxu0  ;;  %v3149_v12 = vmul.f32 %v6819_v63, %v6819_v63  ;;  %v3161_v18 = vsel %vm575_vm0, %v3148_v31, 0.0 }
 0x3ff   : > { %v3157_v36 = vsel %vm575_vm0, %v3146_v20, 0.0  ;;  %v3129_v39 = vsel %vm575_vm0, %v6821_v2, 0.0  ;;  %v3147_v43 = vmul.f32 %v6821_v2, %v6821_v2  ;;  %v3133_v13 = vsel %vm575_vm0, %v6819_v63, 0.0 }
 0x400   : > { %v3158_v59 = vadd.f32 %v3157_v36, %v3156_v37  ;;  %v3130_v32 = vadd.f32 %v3129_v39, %v3128_v6  ;;  %v3163_v3 = vsel %vm575_vm0, %v3149_v12, 0.0 }
 0x401   : > { %v3159_v62 = vsel %vm575_vm0, %v3147_v43, 0.0 }
 0x402   : > { %v3132_v11 = vadd.f32 %v3131_v38, %v3130_v32  ;;  %v3160_v17 = vadd.f32 %v3159_v62, %v3158_v59 }
 0x404   : > { %v3134_v61 = vadd.f32 %v3133_v13, %v3132_v11  ;;  %v3162_v10 = vadd.f32 %v3161_v18, %v3160_v17 }
 0x406   : > { %v3135_v46 = vrot.slane %v3134_v61, 4  ;;  %v3164_v47 = vadd.f32 %v3163_v3, %v3162_v10 }
 0x408   : > { %v3136_v23 = vadd.f32 %v3135_v46, %v3134_v61  ;;  %v3165_v4 = vrot.slane %v3164_v47, 4 }
 0x40a   : > { %v3137_v15 = vrot.slane %v3136_v23, 2  ;;  %v3166_v24 = vadd.f32 %v3165_v4, %v3164_v47 }
 0x40c   : > { %v3138_v21 = vadd.f32 %v3137_v15, %v3136_v23  ;;  %v3167_v1 = vrot.slane %v3166_v24, 2 }
 0x40e   : > { %v3139_v5 = vrot.slane %v3138_v21, 1  ;;  %v3168_v20 = vadd.f32 %v3167_v1, %v3166_v24 }
 0x410   : > { %v3140_v6 = vadd.f32 %v3139_v5, %v3138_v21  ;;  %v3169_v37 = vrot.slane %v3168_v20, 1 }
 0x412   : > { %v3141_v31 = vmul.f32 0.015625, %v3140_v6  ;;  %v3170_v36 = vadd.f32 %v3169_v37, %v3168_v20 }
 0x414   : > { %v3171_v39 = vmul.f32 0.015625, %v3170_v36  ;;  %v3172_v43 = vmul.f32 %v3141_v31, %v3141_v31  ;;  %v3175_v59 = vsub.f32 %v6785_v53, %v3141_v31  ;;  %v3176_v32 = vsub.f32 %v6791_v60, %v3141_v31 }
 0x415   : > { %v3177_v38 = vsub.f32 %v6783_v49, %v3141_v31  ;;  %v3178_v12 = vsub.f32 %v6789_v48, %v3141_v31  ;;  %v3179_v62 = vsub.f32 %v6812_v16, %v3141_v31  ;;  %v3180_v11 = vsub.f32 %v6821_v2, %v3141_v31 }
 0x416   : > { %v3173_v17 = vsub.f32 %v3171_v39, %v3172_v43  ;;  %v3181_v18 = vsub.f32 %v6810_v19, %v3141_v31  ;;  %v3182_v13 = vsub.f32 %v6819_v63, %v3141_v31 }
 0x418   : > { %v3174_v61 = vmax.f32 %v3173_v17, 0.0  ;;  %v5706_v17 = vld [vmem:[%s7308_s4 + $0x20] sm:$0xff]  }
 0x41a   : > { %v3183_v10 = vadd.f32 1e-05, %v3174_v61 }
 0x41c   : > { %5724 = vrsqrt.f32 %v3183_v10 }
 0x426   : > { %v5725_v3 = vpop.eup %5724 }
 0x427   : > { %v6847_v46 = vmul.f32 %v5725_v3, %v3175_v59  ;;  %v6849_v47 = vmul.f32 %v5725_v3, %v3176_v32  ;;  %v6851_v23 = vmul.f32 %v5725_v3, %v3177_v38  ;;  %v6853_v4 = vmul.f32 %v5725_v3, %v3178_v12 }
 0x428   : > { %v6855_v15 = vmul.f32 %v5725_v3, %v3179_v62  ;;  %v6857_v24 = vmul.f32 %v5725_v3, %v3180_v11  ;;  %v6859_v21 = vmul.f32 %v5725_v3, %v3181_v18  ;;  %v6861_v1 = vmul.f32 %v5725_v3, %v3182_v13  ;;  %v3217_v11 = vld [vmem:[#allocation2 + $0x7] sm:$0xff] }
 0x429   : > { %7359 = vst [vmem:[#allocation12_spill] sm:$0xff] %v6847_v46  ;;  %7360 = vst [vmem:[#allocation13_spill] sm:$0xff] %v6849_v47  ;;  %v3193_v5 = vsub.f32 %v6785_v53, %v6847_v46  ;;  %v3194_v20 = vsub.f32 %v6791_v60, %v6849_v47  ;;  %v3195_v6 = vsub.f32 %v6783_v49, %v6851_v23 }
 0x42a   : > { %7361 = vst [vmem:[#allocation14_spill] sm:$0xff] %v6851_v23  ;;  %7362 = vst [vmem:[#allocation15_spill] sm:$0xff] %v6853_v4  ;;  %v3196_v37 = vsub.f32 %v6789_v48, %v6853_v4  ;;  %v3197_v31 = vsub.f32 %v6812_v16, %v6855_v15  ;;  %v3198_v36 = vsub.f32 %v6821_v2, %v6857_v24  ;;  %v7367_v16 = vmax.f32 %v6466_v54, 0.0 }
 0x42b   : > { %7363 = vst [vmem:[#allocation16_spill] sm:$0xff] %v6855_v15  ;;  %7364 = vst [vmem:[#allocation17_spill] sm:$0xff] %v6857_v24  ;;  %v3199_v39 = vsub.f32 %v6810_v19, %v6859_v21  ;;  %v3200_v53 = vsub.f32 %v6819_v63, %v6861_v1  ;;  %v3201_v60 = vadd.f32 %v3193_v5, %v2001_v41  ;;  %v7368_v2 = vmax.f32 %v6493_v33, 0.0 }
 0x42c   : > { %7365 = vst [vmem:[#allocation18_spill] sm:$0xff] %v6859_v21  ;;  %7366 = vst [vmem:[#allocation19_spill] sm:$0xff] %v6861_v1  ;;  %v3202_v49 = vadd.f32 %v3194_v20, %v2002_v57  ;;  %v3203_v48 = vadd.f32 %v3195_v6, %v2003_v27  ;;  %v3204_v43 = vadd.f32 %v3196_v37, %v7367_v16  ;;  %v7369_v19 = vmax.f32 %v6499_v40, 0.0  ;;  %v5705_v40 = vld [vmem:[%s7308_s4 + $0x8] sm:$0xff]  }
 0x42d   : > { %v3205_v59 = vadd.f32 %v3197_v31, %v7368_v2  ;;  %v7370_v63 = vmax.f32 %v6491_v50, 0.0  ;;  %v3208_v41 = vadd.f32 %v3200_v53, %v7371_v30  ;;  %3209 = vst.msk [vmem:[#allocation2 + $0x10] sm:$0xff] %vm575_vm0, %v3201_v60  ;;  %v3225_v10 = vmul.f32 %v3217_v11, %v6151_v7  ;;  %v5707_v11 = vld [vmem:[%s7308_s4 + $0x28] sm:$0xff]  }
 0x42e   : > { %v3206_v32 = vadd.f32 %v3198_v36, %v7369_v19  ;;  %3210 = vst.msk [vmem:[#allocation2 + $0x18] sm:$0xff] %vm575_vm0, %v3202_v49  ;;  %3211 = vst.msk [vmem:[#allocation2 + $0x20] sm:$0xff] %vm575_vm0, %v3203_v48 }
 0x42f   : > { %v3207_v38 = vadd.f32 %v3199_v39, %v7370_v63  ;;  %3212 = vst.msk [vmem:[#allocation2 + $0x28] sm:$0xff] %vm575_vm0, %v3204_v43  ;;  %3213 = vst.msk [vmem:[#allocation2 + $0x30] sm:$0xff] %vm575_vm0, %v3205_v59 }
 0x430   : > { %3214 = vst.msk [vmem:[#allocation2 + $0x38] sm:$0xff] %vm575_vm0, %v3206_v32  ;;  %3216 = vst.msk [vmem:[#allocation2 + $0x48] sm:$0xff] %vm575_vm0, %v3208_v41 }
 0x431   : > { %3215 = vst.msk [vmem:[#allocation2 + $0x40] sm:$0xff] %vm575_vm0, %v3207_v38 }
 0x434   : > { %v6903_v27 = vld [vmem:[#allocation2 + $0x10] sm:$0xff] }
 0x435   : > { %v6905_v54 = vld [vmem:[#allocation2 + $0x18] sm:$0xff]  ;;  %v6907_v34 = vld [vmem:[#allocation2 + $0x20] sm:$0xff]  ;;  %v3254_v57 = vpack.c.bf16 %v6903_v27, %v3241_v29  ;;  %v6928_v62 = vld [vmem:[#allocation2 + $0xf] sm:$0xff] }
 0x436   : > { %v6912_v50 = vpack.c.bf16 %v6907_v34, %v6905_v54  ;;  %v6914_v33 = vld [vmem:[#allocation2 + $0x28] sm:$0xff]  ;;  %v6916_v55 = vld [vmem:[#allocation2 + $0x30] sm:$0xff]  ;;  %v3226_v61 = vmul.f32 %v6928_v62, %v6177_v44  ;;  %v6949_v5 = vld [vmem:[#allocation2 + $0x1f] sm:$0xff] }
 0x437   : > { %5305 = vmatprep.mubr.msk.bf16.mxu1 %vm575_vm0, %v3254_v57  ;;  %v6924_v12 = vpack.c.bf16 %v6916_v55, %v6914_v33  ;;  %v6936_v18 = vld [vmem:[#allocation2 + $0x38] sm:$0xff]  ;;  %v6953_v6 = vld [vmem:[#allocation2 + $0x27] sm:$0xff]  ;;  %v6955_v37 = vld [vmem:[#allocation2 + $0x2f] sm:$0xff]  ;;  %v3228_v36 = vmul.f32 %v6949_v5, %v6179_v45  ;;  %v6980_v2 = vmul.f32 %v6949_v5, %v6177_v44 }
 0x438   : > { %5306 = vmatmul.mubr.msk.bf16.vlgmr.msra.gmra.mrb[8].mxu1 %vm575_vm0, %v6912_v50  ;;  %v6938_v13 = vld [vmem:[#allocation2 + $0x40] sm:$0xff]  ;;  %v6947_v3 = vld [vmem:[#allocation2 + $0x17] sm:$0xff]  ;;  %v3237_v20 = vpack.c.bf16 %v3226_v61, %v3225_v10  ;;  %v3229_v49 = vmul.f32 %v6953_v6, %v6209_v25  ;;  %v3230_v48 = vmul.f32 %v6955_v37, %v6211_v26  ;;  %v6984_v59 = vmul.f32 %v6953_v6, %v6153_v9  ;;  %v6986_v19 = vld [vmem:[#allocation2 + $0x29] sm:$0xff] }
 0x439   : > { %5314 = vmatpush3.bf16.msra.mxu1 %v6780_v58  ;;  %5309 = vmatprep.mubr.msk.bf16.mxu1 %vm575_vm0, %v6924_v12  ;;  %v6945_v58 = vpack.c.bf16 %v6938_v13, %v6936_v18  ;;  %v3227_v31 = vmul.f32 %v6947_v3, %v6153_v9  ;;  %v6962_v39 = vld [vmem:[#allocation2 + $0x37] sm:$0xff]  ;;  %v6964_v53 = vld [vmem:[#allocation2 + $0x3f] sm:$0xff]  ;;  %v6968_v60 = vmul.f32 %v6947_v3, %v6151_v7  ;;  %v3436_v61 = vld [vmem:[#allocation2 + $0x9] sm:$0xff] }
 0x43a   : > { %5315 = vmatprep.subr.bf16.mxu1 %v5705_v40  ;;  %v6974_v16 = vld [vmem:[#allocation2 + $0x19] sm:$0xff]  ;;  %v6976_v43 = vld [vmem:[#allocation2 + $0x21] sm:$0xff]  ;;  %v6988_v32 = vld [vmem:[#allocation2 + $0x31] sm:$0xff]  ;;  %v6994_v38 = vmul.f32 %v6955_v37, %v6179_v45  ;;  %v6998_v30 = vmul.f32 %v6962_v39, %v6209_v25  ;;  %v7002_v41 = vmul.f32 %v6964_v53, %v6211_v26  ;;  %v3232_v21 = vmul.f32 %v6964_v53, %v6254_v52 }
 0x43b   : > { %v6990_v63 = vld [vmem:[#allocation2 + $0x39] sm:$0xff]  ;;  %v3238_v29 = vpack.c.bf16 %v3228_v36, %v3227_v31  ;;  %v7004_v57 = vld [vmem:[#allocation2 + $0x41] sm:$0xff]  ;;  %v7021_v31 = vmul.f32 %v6976_v43, %v6289_v8  ;;  %v3239_v36 = vpack.c.bf16 %v3230_v48, %v3229_v49  ;;  %v7029_v24 = vmul.f32 %v6988_v32, %v6310_v0  ;;  %v7036_v1 = vld [vmem:[#allocation2 + $0x11] sm:$0xff] }
 0x43c   : > { %v7033_v10 = vmul.f32 %v6990_v63, %v6332_v56  ;;  %v7042_v48 = vmul.f32 %v7004_v57, %v6334_v42  ;;  %v5708_v49 = vld [vmem:[%s7308_s4 + $0x30] sm:$0xff]   ;;  %v3446_v46 = vmul.f32 %v6974_v16, %v6308_v35  ;;  %v3447_v23 = vmul.f32 %v6976_v43, %v6310_v0 }
 0x43d   : > { %5316 = vmatpush3.bf16.msra.mxu1 %v5705_v40  ;;  %v7025_v40 = vmul.f32 %v6986_v19, %v6308_v35  ;;  %v3449_v47 = vmul.f32 %v6988_v32, %v6334_v42 }
 0x43e   : > { %5325 = vmatprep.subr.bf16.mxu1 %v5706_v17 }
 0x440   : > { %5310 = vmatmul.mubr.msk.bf16.gmra.mrb[12].mxu1 %vm575_vm0, %v6945_v58 }
 0x441   : > { %5317 = vmatprep.mubr.msk.bf16.mxu1 %vm575_vm0, %v3237_v20  ;;  %v7017_v20 = vmul.f32 %v6974_v16, %v6287_v14 }
 0x448   : > { %5318 = vmatmul.mubr.msk.bf16.vlgmr.msra.gmra.mrb[8].mxu1 %vm575_vm0, %v3238_v29  ;;  %v3231_v29 = vmul.f32 %v6962_v39, %v6252_v51 }
 0x449   : > { %5326 = vmatpush3.bf16.msra.mxu1 %v5706_v17  ;;  %5321 = vmatprep.mubr.msk.bf16.mxu1 %vm575_vm0, %v3239_v36  ;;  %v3444_v17 = vmul.f32 %v3436_v61, %v6287_v14  ;;  %v3445_v36 = vmul.f32 %v7036_v1, %v6289_v8  ;;  %v3448_v61 = vmul.f32 %v6986_v19, %v6332_v56 }
 0x44a   : > { %5327 = vmatprep.subr.bf16.mxu1 %v5707_v11  ;;  %v3240_v15 = vpack.c.bf16 %v3232_v21, %v3231_v29  ;;  %v5709_v21 = vld [vmem:[%s7308_s4 + $0x38] sm:$0xff]   ;;  %v3451_v29 = vmul.f32 %v7004_v57, %v6363_v28 }
 0x44b   : > { %v3457_v4 = vpack.c.bf16 %v3445_v36, %v3444_v17  ;;  %v3568_v36 = vmul.f32 %v6949_v5, %v6153_v9  ;;  %v3572_v9 = vmul.f32 %v6964_v53, %v6252_v51  ;;  %v3693_v5 = vpack.c.bf16 %v6905_v54, %v6903_v27  ;;  %v5714_v27 = vld [vmem:[%s7308_s4 + $0x60] sm:$0xff]   ;;  %v3687_v54 = vld [vmem:[#allocation2 + $0x48] sm:$0xff] }
 0x44c   : > { %v3804_v53 = vmul.f32 %v6976_v43, %v6308_v35  ;;  %v3808_v35 = vmul.f32 %v7004_v57, %v6361_v22  ;;  %v7372_v43 = vpack.c.bf16 %v6980_v2, %v6968_v60  ;;  %v7374_v57 = vpack.c.bf16 %v7002_v41, %v6998_v30 }
 0x44d   : > { %5328 = vmatpush3.bf16.msra.mxu1 %v5707_v11  ;;  %v3458_v11 = vpack.c.bf16 %v3447_v23, %v3446_v46  ;;  %v5710_v46 = vld [vmem:[%s7308_s4 + $0x40] sm:$0xff]   ;;  %v3566_v23 = vmul.f32 %v6928_v62, %v6151_v7  ;;  %v3570_v7 = vmul.f32 %v6955_v37, %v6209_v25  ;;  %v5712_v25 = vld [vmem:[%s7308_s4 + $0x50] sm:$0xff]   ;;  %v5713_v37 = vld [vmem:[%s7308_s4 + $0x58] sm:$0xff]  }
 0x44e   : > { %5337 = vmatprep.subr.bf16.mxu1 %v5708_v49 }
 0x450   : > { %5322 = vmatmul.mubr.msk.bf16.gmra.mrb[12].mxu1 %vm575_vm0, %v3240_v15  ;;  %v3459_v15 = vpack.c.bf16 %v3449_v47, %v3448_v61  ;;  %v3567_v47 = vmul.f32 %v6947_v3, %v6177_v44  ;;  %v3569_v61 = vmul.f32 %v6953_v6, %v6179_v45  ;;  %v3571_v44 = vmul.f32 %v6962_v39, %v6211_v26  ;;  %v5711_v3 = vld [vmem:[%s7308_s4 + $0x48] sm:$0xff]  }
 0x451   : > { %5329 = vmatprep.mubr.msk.bf16.mxu1 %vm575_vm0, %v3457_v4  ;;  %v3450_v4 = vmul.f32 %v6990_v63, %v6361_v22  ;;  %v3694_v6 = vpack.c.bf16 %v6914_v33, %v6907_v34  ;;  %v3695_v39 = vpack.c.bf16 %v6936_v18, %v6916_v55  ;;  %v3802_v34 = vmul.f32 %v7036_v1, %v6287_v14 }
 0x452   : > { %v3579_v17 = vpack.c.bf16 %v3567_v47, %v3566_v23  ;;  %v3580_v62 = vpack.c.bf16 %v3569_v61, %v3568_v36  ;;  %v3803_v33 = vmul.f32 %v6974_v16, %v6289_v8  ;;  %v3696_v55 = vpack.c.bf16 %v3687_v54, %v6938_v13  ;;  %v5715_v13 = vld [vmem:[%s7308_s4 + $0x68] sm:$0xff]  }
 0x453   : > { %v3806_v14 = vmul.f32 %v6988_v32, %v6332_v56  ;;  %v3807_v8 = vmul.f32 %v6990_v63, %v6334_v42  ;;  %v5716_v56 = vld [vmem:[%s7308_s4 + $0x70] sm:$0xff]   ;;  %v7373_v63 = vpack.c.bf16 %v6994_v38, %v6984_v59  ;;  %v5719_v59 = vld [vmem:[%s7308_s4 + $0x88] sm:$0xff]   ;;  %v7376_v38 = vpack.c.bf16 %v7029_v24, %v7025_v40  ;;  %v4863_v40 = vld [vmem:[%s7315_s11] ss:$0 sm:$0xff] }
 0x454   : > { %v3815_v18 = vpack.c.bf16 %v3803_v33, %v3802_v34  ;;  %v3923_v32 = vld [vmem:[#allocation2 + $0x4f] sm:$0xff] }
 0x455   : > { %v3817_v16 = vpack.c.bf16 %v3807_v8, %v3806_v14  ;;  %v3931_v2 = vmul.f32 %v3923_v32, %v6254_v52  ;;  %v5721_v24 = vld [vmem:[%s7309_s5 + $0x8] sm:$0xff]  }
 0x458   : > { %5330 = vmatmul.mubr.msk.bf16.vlgmr.msra.gmra.mrb[8].mxu1 %vm575_vm0, %v3458_v11  ;;  %v3581_v11 = vpack.c.bf16 %v3571_v44, %v3570_v7 }
 0x459   : > { %5338 = vmatpush3.bf16.msra.mxu1 %v5708_v49  ;;  %5333 = vmatprep.mubr.msk.bf16.mxu1 %vm575_vm0, %v3459_v15  ;;  %v3460_v49 = vpack.c.bf16 %v3451_v29, %v3450_v4  ;;  %v3805_v15 = vmul.f32 %v6986_v19, %v6310_v0  ;;  %v3801_v4 = vld [vmem:[#allocation2 + $0x49] sm:$0xff]  ;;  %v5717_v19 = vld [vmem:[%s7308_s4 + $0x78] sm:$0xff]   ;;  %v5718_v29 = vld [vmem:[%s7308_s4 + $0x80] sm:$0xff]  }
 0x45a   : > { %5339 = vmatprep.subr.bf16.mxu1 %v5709_v21  ;;  %v3809_v0 = vmul.f32 %v3801_v4, %v6363_v28  ;;  %v4166_v30 = vmul.f32 %v3801_v4, %v6361_v22  ;;  %v4862_v22 = vld [vmem:[%s7314_s10] ss:$0 sm:$0xff] }
 0x45b   : > { %v3816_v1 = vpack.c.bf16 %v3805_v15, %v3804_v53  ;;  %v7381_v53 = vld [vmem:[#allocation13_spill] sm:$0xff] }
 0x45c   : > { %v3818_v42 = vpack.c.bf16 %v3809_v0, %v3808_v35 }
 0x45d   : > { %5340 = vmatpush3.bf16.msra.mxu1 %v5709_v21  ;;  %v3565_v21 = vld [vmem:[#allocation2 + $0x47] sm:$0xff] }
 0x45e   : > { %5349 = vmatprep.subr.bf16.mxu1 %v5710_v46  ;;  %v3573_v45 = vmul.f32 %v3565_v21, %v6254_v52  ;;  %v3930_v60 = vmul.f32 %v3565_v21, %v6252_v51  ;;  %v4045_v51 = vld [vmem:[#allocation2 + $0x50] sm:$0xff] }
 0x45f   : > { %v4054_v52 = vpack.c.bf16 %v4045_v51, %v3687_v54  ;;  %v7380_v54 = vld [vmem:[#allocation15_spill] sm:$0xff] }
 0x460   : > { %5334 = vmatmul.mubr.msk.bf16.gmra.mrb[12].mxu1 %vm575_vm0, %v3460_v49  ;;  %v3582_v26 = vpack.c.bf16 %v3573_v45, %v3572_v9  ;;  %v7378_v9 = vld [vmem:[#allocation14_spill] sm:$0xff] }
 0x461   : > { %5341 = vmatprep.mubr.msk.bf16.mxu1 %vm575_vm0, %v3579_v17 }
 0x468   : > { %5342 = vmatmul.mubr.msk.bf16.vlgmr.msra.gmra.mrb[8].mxu1 %vm575_vm0, %v3580_v62 }
 0x469   : > { %5350 = vmatpush3.bf16.msra.mxu1 %v5710_v46  ;;  %5345 = vmatprep.mubr.msk.bf16.mxu1 %vm575_vm0, %v3581_v11  ;;  %v3940_v46 = vpack.c.bf16 %v3931_v2, %v3930_v60 }
 0x46a   : > { %5351 = vmatprep.subr.bf16.mxu1 %v5711_v3 }
 0x46d   : > { %5352 = vmatpush3.bf16.msra.mxu1 %v5711_v3  ;;  %v4864_v3 = vld [vmem:[%s7316_s12] ss:$0 sm:$0xff] }
 0x46e   : > { %5361 = vmatprep.subr.bf16.mxu1 %v5712_v25 }
 0x470   : > { %5346 = vmatmul.mubr.msk.bf16.gmra.mrb[12].mxu1 %vm575_vm0, %v3582_v26  ;;  %v4865_v26 = vld [vmem:[%s7317_s13] ss:$0 sm:$0xff] }
 0x471   : > { %5353 = vmatprep.mubr.msk.bf16.mxu1 %vm575_vm0, %v3693_v5  ;;  %v7379_v5 = vld [vmem:[#allocation12_spill] sm:$0xff] }
 0x478   : > { %5354 = vmatmul.mubr.msk.bf16.vlgmr.msra.gmra.mrb[8].mxu1 %vm575_vm0, %v3694_v6 }
 0x479   : > { %5362 = vmatpush3.bf16.msra.mxu1 %v5712_v25  ;;  %5357 = vmatprep.mubr.msk.bf16.mxu1 %vm575_vm0, %v3695_v39 }
 0x47a   : > { %5363 = vmatprep.subr.bf16.mxu1 %v5713_v37 }
 0x47d   : > { %5364 = vmatpush3.bf16.msra.mxu1 %v5713_v37 }
 0x47e   : > { %5373 = vmatprep.subr.bf16.mxu1 %v5714_v27 }
 0x480   : > { %5358 = vmatmul.mubr.msk.bf16.gmra.mrb[12].mxu1 %vm575_vm0, %v3696_v55 }
 0x481   : > { %5365 = vmatprep.mubr.msk.bf16.mxu1 %vm575_vm0, %v3815_v18 }
 0x488   : > { %5366 = vmatmul.mubr.msk.bf16.vlgmr.msra.gmra.mrb[8].mxu1 %vm575_vm0, %v3816_v1 }
 0x489   : > { %5374 = vmatpush3.bf16.msra.mxu1 %v5714_v27  ;;  %5369 = vmatprep.mubr.msk.bf16.mxu1 %vm575_vm0, %v3817_v16 }
 0x48a   : > { %5375 = vmatprep.subr.bf16.mxu1 %v5715_v13 }
 0x48d   : > { %5376 = vmatpush3.bf16.msra.mxu1 %v5715_v13 }
 0x48e   : > { %5385 = vmatprep.subr.bf16.mxu1 %v5716_v56 }
 0x490   : > { %5370 = vmatmul.mubr.msk.bf16.gmra.mrb[12].mxu1 %vm575_vm0, %v3818_v42 }
 0x491   : > { %5377 = vmatprep.mubr.msk.bf16.mxu1 %vm575_vm0, %v7372_v43 }
 0x498   : > { %5378 = vmatmul.mubr.msk.bf16.vlgmr.msra.gmra.mrb[8].mxu1 %vm575_vm0, %v7373_v63 }
 0x499   : > { %5386 = vmatpush3.bf16.msra.mxu1 %v5716_v56  ;;  %5381 = vmatprep.mubr.msk.bf16.mxu1 %vm575_vm0, %v7374_v57 }
 0x49a   : > { %5387 = vmatprep.subr.bf16.mxu1 %v5717_v19 }
 0x49d   : > { %5388 = vmatpush3.bf16.msra.mxu1 %v5717_v19 }
 0x49e   : > { %5397 = vmatprep.subr.bf16.mxu1 %v5718_v29 }
 0x4a0   : > { %5382 = vmatmul.mubr.msk.bf16.gmra.mrb[12].mxu1 %vm575_vm0, %v3940_v46 }
 0x4a1   : > { %5389 = vmatprep.mubr.msk.bf16.mxu1 %vm575_vm0, %v6912_v50  ;;  %v7375_v50 = vpack.c.bf16 %v7021_v31, %v7017_v20  ;;  %v5720_v20 = vld [vmem:[%s7309_s5] sm:$0xff]  }
 0x4a2   : > { %5409 = vmatprep.subr.bf16.mxu0 %v5720_v20 }
 0x4a3   : > { %5410 = vmatpush3.bf16.msra.mxu0 %v5720_v20  ;;  %v7384_v20 = vld [vmem:[#allocation19_spill] sm:$0xff] }
 0x4a4   : > { %5411 = vmatprep.subr.bf16.mxu0 %v5721_v24 }
 0x4a7   : > { %5412 = vmatpush3.bf16.msra.mxu0 %v5721_v24 }
 0x4a8   : > { %5390 = vmatmul.mubr.msk.bf16.vlgmr.msra.gmra.mrb[8].mxu1 %vm575_vm0, %v6924_v12  ;;  %v7377_v12 = vpack.c.bf16 %v7042_v48, %v7033_v10 }
 0x4a9   : > { %5398 = vmatpush3.bf16.msra.mxu1 %v5718_v29  ;;  %5393 = vmatprep.mubr.msk.bf16.mxu1 %vm575_vm0, %v6945_v58  ;;  %v4159_v58 = vld [vmem:[#allocation2 + $0x51] sm:$0xff] }
 0x4aa   : > { %5399 = vmatprep.subr.bf16.mxu1 %v5719_v59  ;;  %v4167_v41 = vmul.f32 %v4159_v58, %v6363_v28 }
 0x4ac   : > { %v4176_v23 = vpack.c.bf16 %v4167_v41, %v4166_v30 }
 0x4ad   : > { %5400 = vmatpush3.bf16.msra.mxu1 %v5719_v59  ;;  %v7382_v59 = vld [vmem:[#allocation18_spill] sm:$0xff] }
 0x4b0   : > { %5394 = vmatmul.mubr.msk.bf16.gmra.mrb[12].mxu1 %vm575_vm0, %v4054_v52 }
 0x4b1   : > { %5401 = vmatprep.mubr.msk.bf16.mxu1 %vm575_vm0, %v7375_v50  ;;  %v7383_v50 = vld [vmem:[#allocation16_spill] sm:$0xff] }
 0x4b8   : > { %5402 = vmatmul.mubr.msk.bf16.vlgmr.msra.gmra.mrb[8].mxu1 %vm575_vm0, %v7376_v38 }
 0x4b9   : > { %5405 = vmatprep.mubr.msk.bf16.mxu1 %vm575_vm0, %v7377_v12 }
 0x4c0   : > { %5406 = vmatmul.mubr.msk.bf16.gmra.mrb[12].mxu1 %vm575_vm0, %v4176_v23 }
 0x58b   : > { %v5403_v28 = vpop.f32.mrb[8].mxu1 }
 0x58c   : > { %v4283_v10 = vmul.f32 %v5403_v28, %v4862_v22  ;;  %v4235_v31 = vpop.f32.mrb[9].mxu1  ;;  %v7385_v28 = vld [vmem:[#allocation17_spill] sm:$0xff] }
 0x58d   : > { %v4281_v48 = vmul.f32 %v4862_v22, %v4235_v31  ;;  %v5404_v47 = vpop.f32.mrb[10].mxu1 }
 0x58e   : > { %v4298_v49 = vadd.f32 %v4863_v40, %v4283_v10  ;;  %v4284_v17 = vmul.f32 %v5404_v47, %v4862_v22  ;;  %v4238_v36 = vpop.f32.mrb[11].mxu1 }
 0x58f   : > { %v4296_v61 = vadd.f32 %v4863_v40, %v4281_v48  ;;  %v4282_v7 = vmul.f32 %v4862_v22, %v4238_v36 }
 0x590   : > { %v4306_v44 = vmax.f32 %v4298_v49, 0.0  ;;  %v4299_v62 = vadd.f32 %v4863_v40, %v4284_v17 }
 0x591   : > { %v4304_v11 = vmax.f32 %v4296_v61, 0.0  ;;  %v4297_v21 = vadd.f32 %v4863_v40, %v4282_v7 }
 0x592   : > { %v4314_v45 = vadd.f32 %v4306_v44, %v7378_v9  ;;  %v4307_v25 = vmax.f32 %v4299_v62, 0.0 }
 0x593   : > { %v4312_v6 = vadd.f32 %v4304_v11, %v7379_v5  ;;  %v4305_v37 = vmax.f32 %v4297_v21, 0.0  ;;  %v5407_v39 = vpop.f32.mrb[12].mxu1 }
 0x594   : > { %v4329_v27 = vmul.f32 %v4864_v3, %v4314_v45  ;;  %v4315_v34 = vadd.f32 %v4307_v25, %v7380_v54  ;;  %v4287_v33 = vmul.f32 %v5407_v39, %v4862_v22  ;;  %v4251_v55 = vpop.f32.mrb[13].mxu1  ;;  %v4873_v45 = vld [vmem:[%s7319_s15] ss:$0 sm:$0xff] }
 0x595   : > { %v4327_v18 = vmul.f32 %v4864_v3, %v4312_v6  ;;  %v4313_v15 = vadd.f32 %v4305_v37, %v7381_v53  ;;  %v4285_v14 = vmul.f32 %v4862_v22, %v4251_v55  ;;  %v5408_v8 = vpop.f32.mrb[14].mxu1  ;;  %v5727_v53 = vld [vmem:[%s5960_s27] sm:$0xff] }
 0x596   : > { %v4344_v1 = vadd.f32 %v4865_v26, %v4329_v27  ;;  %v4330_v13 = vmul.f32 %v4864_v3, %v4315_v34  ;;  %v4302_v16 = vadd.f32 %v4863_v40, %v4287_v33  ;;  %v4288_v4 = vmul.f32 %v5408_v8, %v4862_v22  ;;  %v4254_v35 = vpop.f32.mrb[15].mxu1  ;;  %v5726_v33 = vld [vmem:[%s5960_s27 + $0x10] sm:$0xff] }
 0x597   : > { %v4342_v0 = vadd.f32 %v4865_v26, %v4327_v18  ;;  %v4328_v56 = vmul.f32 %v4864_v3, %v4313_v15  ;;  %v4300_v42 = vadd.f32 %v4863_v40, %v4285_v14  ;;  %v4286_v43 = vmul.f32 %v4862_v22, %v4254_v35 }
 0x598   : > { %v4345_v19 = vadd.f32 %v4865_v26, %v4330_v13  ;;  %v4310_v32 = vmax.f32 %v4302_v16, 0.0  ;;  %v4303_v63 = vadd.f32 %v4863_v40, %v4288_v4  ;;  %v4352_v29 = vmax.f32 %v4344_v1, 0.0  ;;  %v5728_v1 = vld [vmem:[%s5960_s27 + $0x18] sm:$0xff]  ;;  %v5729_v4 = vld [vmem:[%s5960_s27 + $0x8] sm:$0xff] }
 0x599   : > { %v4343_v57 = vadd.f32 %v4865_v26, %v4328_v56  ;;  %v4308_v60 = vmax.f32 %v4300_v42, 0.0  ;;  %v4301_v2 = vadd.f32 %v4863_v40, %v4286_v43  ;;  %v4350_v58 = vmax.f32 %v4342_v0, 0.0 }
 0x59a   : > { %v4353_v46 = vmax.f32 %v4345_v19, 0.0  ;;  %v4318_v51 = vadd.f32 %v4310_v32, %v7382_v59  ;;  %v4311_v52 = vmax.f32 %v4303_v63, 0.0  ;;  %v5730_v59 = vld [vmem:[%s5960_s27 + $0x30] sm:$0xff] }
 0x59b   : > { %v4316_v38 = vadd.f32 %v4308_v60, %v7383_v50  ;;  %v4309_v12 = vmax.f32 %v4301_v2, 0.0  ;;  %v4351_v30 = vmax.f32 %v4343_v57, 0.0  ;;  %v5731_v50 = vld [vmem:[%s5960_s27 + $0x20] sm:$0xff] }
 0x59c   : > { %v4363_v41 = vpack.c.bf16 %v4353_v46, %v4352_v29  ;;  %v4333_v23 = vmul.f32 %v4864_v3, %v4318_v51  ;;  %v4319_v24 = vadd.f32 %v4311_v52, %v7384_v20  ;;  %v5733_v20 = vld [vmem:[%s5960_s27 + $0x28] sm:$0xff] }
 0x59d   : > { %v4331_v22 = vmul.f32 %v4864_v3, %v4316_v38  ;;  %v4317_v10 = vadd.f32 %v4309_v12, %v7385_v28  ;;  %v4362_v31 = vpack.c.bf16 %v4351_v30, %v4350_v58  ;;  %v5732_v30 = vld [vmem:[%s5960_s27 + $0x38] sm:$0xff]  ;;  %s5734_s27 = scalar_lea.vmem %s7256_s29, 1024 }
 0x59e   : > { %v4348_v48 = vadd.f32 %v4865_v26, %v4333_v23  ;;  %v4334_v40 = vmul.f32 %v4864_v3, %v4319_v24  ;;  %p5735_p11 = scmp.ne.s32.totalorder %s7256_s29, %s5734_s27  ;;  %p5742_p1 = scmp.lt.s32.totalorder %s5740_s20, %s5734_s27 }
 0x59f   : > { %v4346_v47 = vadd.f32 %v4865_v26, %v4331_v22  ;;  %v4332_v49 = vmul.f32 %v4864_v3, %v4317_v10  ;;  %5413 = vmatprep.mubr.msk.bf16.mxu0 %vm575_vm0, %v4362_v31  ;;  %v4872_v3 = vld [vmem:[%s7318_s14] ss:$0 sm:$0xff] }
 0x5a0   : > { %v4349_v17 = vadd.f32 %v4865_v26, %v4334_v40  ;;  %5414 = vmatmul.mubr.msk.bf16.vlgmr.msra.gmra.mrb[24].mxu0 %vm575_vm0, %v4363_v41  ;;  %v4356_v61 = vmax.f32 %v4348_v48, 0.0  ;;  %p5736_p12 = pnand %p5735_p11, %p5936_p5  ;;  %p5743_p2 = por %p5742_p1, %p5741_p0 }
 0x5a1   : > { %v4347_v36 = vadd.f32 %v4865_v26, %v4332_v49  ;;  %v4354_v44 = vmax.f32 %v4346_v47, 0.0 }
 0x5a2   : > { %v4357_v7 = vmax.f32 %v4349_v17, 0.0  ;;  %p5737_p13 = pneg %p5736_p12 }
 0x5a3   : > { %v4355_v62 = vmax.f32 %v4347_v36, 0.0 }
 0x5a4   : > { %v4365_v11 = vpack.c.bf16 %v4357_v7, %v4356_v61  ;;  %p5744_p3 = pnand %p5743_p2, %p5737_p13 }
 0x5a5   : > { %v4364_v21 = vpack.c.bf16 %v4355_v62, %v4354_v44 }
 0x5a7   : > { %5417 = vmatprep.mubr.msk.bf16.mxu0 %vm575_vm0, %v4364_v21 }
 0x5a8   : > { %5418 = vmatmul.mubr.msk.bf16.gmra.mrb[28].mxu0 %vm575_vm0, %v4365_v11 }
 0x673   : > { %v5415_v9 = vpop.f32.mrb[24].mxu0 }
 0x674   : > { %v4464_v25 = vmul.f32 %v5415_v9, %v4872_v3  ;;  %v4424_v26 = vpop.f32.mrb[25].mxu0 }
 0x675   : > { %v4462_v5 = vmul.f32 %v4872_v3, %v4424_v26  ;;  %v5416_v6 = vpop.f32.mrb[26].mxu0 }
 0x676   : > { %v4479_v37 = vadd.f32 %v4873_v45, %v4464_v25  ;;  %v4465_v39 = vmul.f32 %v5416_v6, %v4872_v3  ;;  %v4427_v27 = vpop.f32.mrb[27].mxu0 }
 0x677   : > { %v4477_v54 = vadd.f32 %v4873_v45, %v4462_v5  ;;  %v4463_v34 = vmul.f32 %v4872_v3, %v4427_v27 }
 0x678   : > { %v4487_v55 = vadd.f32 %v5726_v33, %v4479_v37  ;;  %v4480_v18 = vadd.f32 %v4873_v45, %v4465_v39 }
 0x679   : > { %v4485_v15 = vadd.f32 %v5727_v53, %v4477_v54  ;;  %v4478_v14 = vadd.f32 %v4873_v45, %v4463_v34 }
 0x67a   : > { %v4495_v8 = vmax.f32 %v4487_v55, 0.0  ;;  %v4488_v13 = vadd.f32 %v5728_v1, %v4480_v18 }
 0x67b   : > { %v4493_v16 = vmax.f32 %v4485_v15, 0.0  ;;  %v4486_v35 = vadd.f32 %v5729_v4, %v4478_v14  ;;  %v5419_v0 = vpop.f32.mrb[28].mxu0 }
 0x67c   : > { %4503 = vst [vmem:[%s7238_s30 + $0x10] sm:$0xff] %v4495_v8  ;;  %v4496_v56 = vmax.f32 %v4488_v13, 0.0  ;;  %v4468_v42 = vmul.f32 %v5419_v0, %v4872_v3  ;;  %v4440_v43 = vpop.f32.mrb[29].mxu0 }
 0x67d   : > { %4501 = vst [vmem:[%s7238_s30] sm:$0xff] %v4493_v16  ;;  %v4494_v19 = vmax.f32 %v4486_v35, 0.0  ;;  %v4466_v32 = vmul.f32 %v4872_v3, %v4440_v43  ;;  %v5420_v63 = vpop.f32.mrb[30].mxu0 }
 0x67e   : > { %4504 = vst [vmem:[%s7238_s30 + $0x18] sm:$0xff] %v4496_v56  ;;  %v4483_v57 = vadd.f32 %v4873_v45, %v4468_v42  ;;  %v4469_v60 = vmul.f32 %v5420_v63, %v4872_v3  ;;  %v4443_v2 = vpop.f32.mrb[31].mxu0 }
 0x67f   : > { %4502 = vst [vmem:[%s7238_s30 + $0x8] sm:$0xff] %v4494_v19  ;;  %v4481_v29 = vadd.f32 %v4873_v45, %v4466_v32  ;;  %v4467_v46 = vmul.f32 %v4872_v3, %v4443_v2 }
 0x680   : > { %v4491_v51 = vadd.f32 %v5730_v59, %v4483_v57  ;;  %v4484_v52 = vadd.f32 %v4873_v45, %v4469_v60 }
 0x681   : > { %v4489_v38 = vadd.f32 %v5731_v50, %v4481_v29  ;;  %v4482_v12 = vadd.f32 %v4873_v45, %v4467_v46 }
 0x682   : > { %v4499_v58 = vmax.f32 %v4491_v51, 0.0  ;;  %v4492_v41 = vadd.f32 %v5732_v30, %v4484_v52 }
 0x683   : > { %v4497_v23 = vmax.f32 %v4489_v38, 0.0  ;;  %v4490_v24 = vadd.f32 %v5733_v20, %v4482_v12 }
 0x684   : > { %4507 = vst [vmem:[%s7238_s30 + $0x30] sm:$0xff] %v4499_v58  ;;  %v4500_v22 = vmax.f32 %v4492_v41, 0.0 }
 0x685   : > { %4505 = vst [vmem:[%s7238_s30 + $0x20] sm:$0xff] %v4497_v23  ;;  %v4498_v28 = vmax.f32 %v4490_v24, 0.0 }
 0x686   : > { %4508 = vst [vmem:[%s7238_s30 + $0x38] sm:$0xff] %v4500_v22 }
 0x687   : > { %4506 = vst [vmem:[%s7238_s30 + $0x28] sm:$0xff] %v4498_v28 }
 0x688   : > { %5747 = shalt.err (!%p5744_p3)
}
 0x689   : > { %s5748_s21 = scalar_lea.hbm %s7254_s24, 1024  ;;  %s5752_s23 = scalar_lea.hbm %s7322_s18, 2048 }
 0x68a   : > { %p5749_p4 = scmp.ne.s32.totalorder %s7254_s24, %s5748_s21  ;;  %p5753_p9 = scmp.lt.u32.totalorder %s7254_s24, %s7322_s18 }
 0x68b   : > { %p5754_p10 = scmp.lt.u32.totalorder %s5752_s23, %s5748_s21  ;;  %p5756_p12 = scmp.lt.u32.totalorder %s5748_s21, %s7254_s24 }
 0x68c   : > { %p5750_p7 = pnand %p5749_p4, %p5936_p5 }
 0x68d   : > { %p5755_p11 = por %p5754_p10, %p5753_p9 }
 0x68e   : > { %p5751_p8 = pneg %p5750_p7 }
 0x68f   : > { %p5757_p13 = por %p5756_p12, %p5755_p11 }
 0x691   : > { %p5758_p0 = pnand %p5757_p13, %p5751_p8 }
 0x693   : > { %5761 = shalt.err (!%p5758_p0)
}
 0x694   : > { %s5801_s27 = smov 128   ;;  %s5802_s20 = smov 8  }
 0x695   : > { %5613 = dma.vmem_to_hbm [thread:$0]  (%p5936_p5), %s7256_s29, 1024, %s7254_s24, %s7263_s0, %s5801_s27, %s5801_s27, %s5802_s20  }
 0x696 PF: > { %s7386_s30 = sld [smem:[#allocation8_spill]]  ;;  %s7387_s22 = sld [smem:[#allocation6_spill]] }
 0x69c   : > { %p5619_p1 = scmp.ge.s32.totalorder %s7386_s30, 2  ;;  %s4538_s25 = sand.u32 1, %s7387_s22  }
 0x69d   : > { %s4539_s21 = scalar_lea.sflag [#allocation4], %s4538_s25 }
 0x69e   : > { %p5616_p2 = pnand %p5619_p1, %p5940_p6 }
 0x6a0   : > { %5779 = dma.done.wait (!%p5616_p2), %s4539_s21, 1024  }
 0x6a1   : > { %5781 = vsyncadd (!%p5616_p2), %s4539_s21, 4294966272  ;;  %s7389_s30 = sld [smem:[#allocation9_spill]]  ;;  %s7390_s23 = sld [smem:[#allocation7_spill]] }
 0x6a2   : > { %s7391_s29 = sld [smem:[#allocation10_spill]]  ;;  %s7392_s27 = smov %s5788_s28 }
 0x6a7   : > { %p28_p3 = scmp.ge.s32.totalorder %s7389_s30, 4   ;;  %s7393_s28 = smov %s7390_s23 }
 0x6a9   :  { %30 = sbr.rel (!%p28_p3) target bundleno = 7 (0x7), region = 151 }
 0x6b0   :  { %4544 = vsyncpa [#allocation4], 1 }
 0x6b1   :  { %4546 = vsyncpa [#allocation4 + $0x1], 1 }

</bundles_post_ra>
